<compile_context>
chip_gen: v7x
topology: tpu7x:2x2x1
jax: 0.10.0
libtpu: 0.0.40
codegen_flags: <defaults>
</compile_context>

<pallas_src>
import functools

import jax
import jax.numpy as jnp
from jax import lax
from jax.experimental import pallas as pl
from jax.experimental.pallas import tpu as pltpu


def _round_up(x, m):
    return ((x + m - 1) // m) * m


# ----------------------------------------------------------------------------
# Fused bidirectional-GRU + hidden_to_output kernel (closure over static dims)
# ----------------------------------------------------------------------------
def _make_gru_decoder_kernel(T, Bpad, H, HP):
    def kernel(xp_ref, h0_ref, wih_ref, bih_ref, whh_ref, bhhn_ref,
               wout_ref, bout_ref, out_ref, gi_ref, hist_ref):
        # xp_ref  : (T*Bpad, Z)   time-major inputs, forward time order only
        # h0_ref  : (Bpad, HP)    [h0_fwd | h0_bwd | 0-pad], HP = roundup(2H,128)
        # wih_ref : (Z, 3*HP)     gate blocks [r|z|n]; within each block lanes
        #                         [0:H) = fwd direction, [H:2H) = bwd direction
        # bih_ref : (1, 3*HP)     b_ih (+ folded b_hh for the r and z blocks)
        # whh_ref : (HP, 3*HP)    block-diagonal hidden-to-hidden
        # bhhn_ref: (1, HP)       b_hn both dirs (must stay inside r*(...))
        # wout_ref: (2*HP, Fpad)  fused output projection
        # bout_ref: (1, Fpad)
        # out_ref : (T*Bpad, Fpad)
        # gi_ref  : (T*Bpad, 3*HP) scratch: hoisted input-to-hidden gates
        # hist_ref: (T*Bpad, 2*HP) scratch: [h(fused step t) | h(fused step T-1-t)]

        # (1) Hoisted input projection: one batched MXU call covers both GRU
        #     directions and all timesteps.
        gi_ref[...] = (
            jnp.dot(xp_ref[...], wih_ref[...], preferred_element_type=jnp.float32)
            + bih_ref[...]
        )

        whh = whh_ref[...]                                        # hoisted load
        bhh_n = jnp.broadcast_to(bhhn_ref[...], (Bpad, HP))       # hoisted bcast
        lane = lax.broadcasted_iota(jnp.int32, (Bpad, 3 * HP), 1)
        fwd_mask = (lane % HP) < H      # True on forward-direction lanes

        # (2) Fused fwd+bwd recurrence; T is small & static -> full unroll so
        #     every scratch offset is static and Bpad-row / 128-lane aligned.
        h = h0_ref[...]
        for t in range(T):
            gi_f = gi_ref[pl.ds(t * Bpad, Bpad), :]
            gi_b = gi_ref[pl.ds((T - 1 - t) * Bpad, Bpad), :]
            gi = jnp.where(fwd_mask, gi_f, gi_b)   # bwd dir reads x[T-1-t]
            gh = jnp.dot(h, whh, preferred_element_type=jnp.float32)
            # PyTorch GRU gate order [r, z, n]; each block is HP lanes wide.
            r = jax.nn.sigmoid(gi[:, 0:HP] + gh[:, 0:HP])
            zt = jax.nn.sigmoid(gi[:, HP:2 * HP] + gh[:, HP:2 * HP])
            n = jnp.tanh(gi[:, 2 * HP:3 * HP] + r * (gh[:, 2 * HP:3 * HP] + bhh_n))
            h = n + zt * (h - n)
            # fwd half of h is the output at time t, bwd half at time T-1-t;
            # zero rows of wout select the correct half of each slot.
            hist_ref[pl.ds(t * Bpad, Bpad), 0:HP] = h
            hist_ref[pl.ds((T - 1 - t) * Bpad, Bpad), HP:2 * HP] = h

        # (3) One fused K=2*HP output matmul over the whole hidden history,
        #     lane-dense (Fpad=128) unmasked store.
        out_ref[...] = (
            jnp.dot(hist_ref[...], wout_ref[...], preferred_element_type=jnp.float32)
            + bout_ref[...]
        ).astype(out_ref.dtype)

    return kernel


# ----------------------------------------------------------------------------
# One-time weight packing (PyTorch layout -> kernel layout)
# ----------------------------------------------------------------------------
def prepare_decoder_params(params):
    H = int(params["hidden_size"])
    F = int(params["num_features"])
    Z = int(params["w_ih_f"].shape[1])
    H2 = 2 * H
    HP = _round_up(H2, 128)          # per-gate lane block, 128-aligned
    FP = _round_up(F, 128)           # lane-dense output width
    f32 = jnp.float32

    wih = jnp.zeros((Z, 3 * HP), f32)
    whh = jnp.zeros((HP, 3 * HP), f32)
    bih = jnp.zeros((1, 3 * HP), f32)
    bhhn = jnp.zeros((1, HP), f32)
    for g in range(3):               # gate order r, z, n (PyTorch)
        c = g * HP
        sl = slice(g * H, (g + 1) * H)
        wih = wih.at[:, c:c + H].set(params["w_ih_f"][sl].T)
        wih = wih.at[:, c + H:c + H2].set(params["w_ih_b"][sl].T)
        whh = whh.at[0:H, c:c + H].set(params["w_hh_f"][sl].T)
        whh = whh.at[H:H2, c + H:c + H2].set(params["w_hh_b"][sl].T)
        bf = params["b_ih_f"][sl]
        bb = params["b_ih_b"][sl]
        if g < 2:                    # fold b_hh into bih for r and z gates
            bf = bf + params["b_hh_f"][sl]
            bb = bb + params["b_hh_b"][sl]
        bih = bih.at[0, c:c + H].set(bf)
        bih = bih.at[0, c + H:c + H2].set(bb)
    bhhn = bhhn.at[0, 0:H].set(params["b_hh_f"][2 * H:3 * H])
    bhhn = bhhn.at[0, H:H2].set(params["b_hh_b"][2 * H:3 * H])

    wout_t = params["w_out"].T.astype(f32)                      # (2H, F)
    wout = jnp.zeros((2 * HP, FP), f32)
    wout = wout.at[0:H, 0:F].set(wout_t[0:H, :])                 # fwd half
    wout = wout.at[HP + H:HP + H2, 0:F].set(wout_t[H:H2, :])     # bwd half
    bout = jnp.zeros((1, FP), f32).at[0, 0:F].set(params["b_out"])

    return {
        "wih": wih, "bih": bih, "whh": whh, "bhhn": bhhn,
        "wout": wout, "bout": bout,
        "w_l2h_t": params["w_l2h"].T.astype(f32),   # (Z, 2H)
        "b_l2h": params["b_l2h"].astype(f32),
    }


# ----------------------------------------------------------------------------
# Forward wrapper
# ----------------------------------------------------------------------------
@functools.partial(jax.jit, static_argnames=("hidden_size", "num_features"))
def decoder_forward(inputs, z, packed, *, hidden_size, num_features):
    """inputs: (B, T, ZDIMS), z: (B, ZDIMS) -> (B, T, NUM_FEATURES)."""
    B, T, Z = inputs.shape
    H = hidden_size
    H2 = 2 * H
    HP = packed["whh"].shape[0]
    FP = packed["wout"].shape[1]
    F = num_features
    Bpad = max(8, _round_up(B, 8))   # full sublane group per timestep
    f32 = jnp.float32

    # latent_to_hidden + torch .view(2, B, H) row-major semantics, repacked to
    # the kernel's [h_fwd | h_bwd | 0-pad] lane layout (tiny; plain jnp).
    hidden = z.astype(f32) @ packed["w_l2h_t"] + packed["b_l2h"]   # (B, 2H)
    h0 = hidden.reshape(2, B, H)
    h0_wide = jnp.concatenate([h0[0], h0[1]], axis=-1)             # (B, 2H)
    h0_pad = jnp.zeros((Bpad, HP), f32).at[0:B, 0:H2].set(h0_wide)

    # Time-major inputs, batch padded to Bpad (the bwd-direction reversal is
    # done inside the kernel with a lane-mask select).
    x_tm = jnp.transpose(inputs, (1, 0, 2)).astype(f32)            # (T, B, Z)
    x_pad = jnp.zeros((T, Bpad, Z), f32).at[:, 0:B, :].set(x_tm)
    xp = x_pad.reshape(T * Bpad, Z)

    kernel = _make_gru_decoder_kernel(T, Bpad, H, HP)
    out_flat = pl.pallas_call(
        kernel,
        out_shape=jax.ShapeDtypeStruct((T * Bpad, FP), f32),
        in_specs=[pl.BlockSpec(memory_space=pltpu.MemorySpace.VMEM)] * 8,
        out_specs=pl.BlockSpec(memory_space=pltpu.MemorySpace.VMEM),
        scratch_shapes=[
            pltpu.VMEM((T * Bpad, 3 * HP), f32),   # precomputed input gates
            pltpu.VMEM((T * Bpad, 2 * HP), f32),   # fused hidden history
        ],
        compiler_params=pltpu.CompilerParams(
            vmem_limit_bytes=32 * 1024 * 1024),
    )(xp, h0_pad, packed["wih"], packed["bih"], packed["whh"],
      packed["bhhn"], packed["wout"], packed["bout"])

    out = out_flat.reshape(T, Bpad, FP)[:, 0:B, 0:F]
    return jnp.transpose(out, (1, 0, 2))   # batch_first (B, T, F)


# ----------------------------------------------------------------------------
# Pure-JAX reference (mirrors torch.nn.GRU / nn.Linear semantics exactly)
# ----------------------------------------------------------------------------
def decoder_reference(inputs, z, params):
    B, T, _ = inputs.shape
    H = params["hidden_size"]
    hidden = z @ params["w_l2h"].T + params["b_l2h"]
    h0 = hidden.reshape(2, B, H)

    def cell(x_t, h, wih, whh, bih, bhh):
        gi = x_t @ wih.T + bih
        gh = h @ whh.T + bhh
        r = jax.nn.sigmoid(gi[:, :H] + gh[:, :H])
        zt = jax.nn.sigmoid(gi[:, H:2 * H] + gh[:, H:2 * H])
        n = jnp.tanh(gi[:, 2 * H:] + r * gh[:, 2 * H:])
        return (1.0 - zt) * n + zt * h

    hf = []
    h = h0[0]
    for t in range(T):
        h = cell(inputs[:, t], h, params["w_ih_f"], params["w_hh_f"],
                 params["b_ih_f"], params["b_hh_f"])
        hf.append(h)
    hb = [None] * T
    h = h0[1]
    for t in range(T - 1, -1, -1):
        h = cell(inputs[:, t], h, params["w_ih_b"], params["w_hh_b"],
                 params["b_ih_b"], params["b_hh_b"])
        hb[t] = h
    dec = jnp.stack([jnp.concatenate([hf[t], hb[t]], axis=-1)
                     for t in range(T)], axis=1)          # (B, T, 2H)
    return dec @ params["w_out"].T + params["b_out"]      # (B, T, F)


# ----------------------------------------------------------------------------
# Deterministic parameter init (PyTorch-shaped) and driver
# ----------------------------------------------------------------------------
def init_params(key, zdims, num_features, hidden_size):
    H, Z, F = hidden_size, zdims, num_features
    ks = jax.random.split(key, 14)
    u = lambda k, shape, bound: jax.random.uniform(
        k, shape, jnp.float32, -bound, bound)
    kg = 1.0 / jnp.sqrt(H)
    return {
        "hidden_size": H,
        "num_features": F,
        # GRU (PyTorch layout): weight_ih (3H, Z), weight_hh (3H, H), biases (3H,)
        "w_ih_f": u(ks[0], (3 * H, Z), kg), "w_hh_f": u(ks[1], (3 * H, H), kg),
        "b_ih_f": u(ks[2], (3 * H,), kg),   "b_hh_f": u(ks[3], (3 * H,), kg),
        "w_ih_b": u(ks[4], (3 * H, Z), kg), "w_hh_b": u(ks[5], (3 * H, H), kg),
        "b_ih_b": u(ks[6], (3 * H,), kg),   "b_hh_b": u(ks[7], (3 * H,), kg),
        # latent_to_hidden: Linear(Z -> 2H)
        "w_l2h": u(ks[8], (2 * H, Z), 1.0 / jnp.sqrt(Z)),
        "b_l2h": u(ks[9], (2 * H,), 1.0 / jnp.sqrt(Z)),
        # hidden_to_output: Linear(2H -> F)
        "w_out": u(ks[10], (F, 2 * H), 1.0 / jnp.sqrt(2 * H)),
        "b_out": u(ks[11], (F,), 1.0 / jnp.sqrt(2 * H)),
    }
    # TODO(synk): dropout_rec is a no-op — PyTorch GRU only applies dropout
    # between layers and n_layers == 1, so there is nothing to translate.


if __name__ == "__main__":
    BATCH = 2
    TEMPORAL_WINDOW = 8
    ZDIMS = 4
    NUM_FEATURES = 6
    HIDDEN_SIZE_REC = 32

    key = jax.random.PRNGKey(0)
    kp, kx, kz = jax.random.split(key, 3)
    params = init_params(kp, ZDIMS, NUM_FEATURES, HIDDEN_SIZE_REC)
    packed = prepare_decoder_params(params)   # one-time weight packing

    inputs = jax.random.normal(kx, (BATCH, TEMPORAL_WINDOW, ZDIMS), jnp.float32)
    z = jax.random.normal(kz, (BATCH, ZDIMS), jnp.float32)

    out = decoder_forward(inputs, z, packed,
                          hidden_size=HIDDEN_SIZE_REC,
                          num_features=NUM_FEATURES)
    out = jax.block_until_ready(out)

    ref = decoder_reference(inputs, z, params)
    assert out.shape == (BATCH, TEMPORAL_WINDOW, NUM_FEATURES), out.shape
    assert jnp.allclose(out, ref, atol=1e-4, rtol=1e-4), \
        float(jnp.max(jnp.abs(out - ref)))

    print("KERNEL_OK")
</pallas_src>

<mosaic_0001>
module attributes {stable_mosaic.version = 11 : i64} {
  func.func @kernel(%arg0: memref<64x4xf32, #tpu.memory_space<vmem>>, %arg1: memref<8x128xf32, #tpu.memory_space<vmem>>, %arg2: memref<4x384xf32, #tpu.memory_space<vmem>>, %arg3: memref<1x384xf32, #tpu.memory_space<vmem>>, %arg4: memref<128x384xf32, #tpu.memory_space<vmem>>, %arg5: memref<1x128xf32, #tpu.memory_space<vmem>>, %arg6: memref<256x128xf32, #tpu.memory_space<vmem>>, %arg7: memref<1x128xf32, #tpu.memory_space<vmem>>, %arg8: memref<64x128xf32, #tpu.memory_space<vmem>>, %arg9: memref<64x384xf32, #tpu.memory_space<vmem>>, %arg10: memref<64x256xf32, #tpu.memory_space<vmem>>) attributes {dimension_semantics = [], scalar_prefetch = 0 : i64, scratch_operands = 2 : i64, tpu.core_type = #tpu.core_type<tc>} {
    %c0 = arith.constant 0 : index
    %c0_0 = arith.constant 0 : index
    %0 = vector.load %arg0[%c0, %c0_0] : memref<64x4xf32, #tpu.memory_space<vmem>>, vector<64x4xf32>
    %c0_1 = arith.constant 0 : index
    %c0_2 = arith.constant 0 : index
    %1 = vector.load %arg2[%c0_1, %c0_2] : memref<4x384xf32, #tpu.memory_space<vmem>>, vector<4x384xf32>
    %cst = arith.constant dense<0.000000e+00> : vector<64x384xf32>
    %2 = tpu.matmul %0, %1, %cst {dimension_numbers = #tpu.dot_dimension_numbers<[1], [0], [0], [1], [0, 0, 1, 1], [], []>} : vector<64x4xf32>, vector<4x384xf32>, vector<64x384xf32> -> vector<64x384xf32>
    %c0_3 = arith.constant 0 : index
    %c0_4 = arith.constant 0 : index
    %3 = vector.load %arg3[%c0_3, %c0_4] : memref<1x384xf32, #tpu.memory_space<vmem>>, vector<1x384xf32>
    %4 = vector.broadcast %3 : vector<1x384xf32> to vector<64x384xf32>
    %5 = arith.addf %2, %4 : vector<64x384xf32>
    %c0_5 = arith.constant 0 : index
    %c0_6 = arith.constant 0 : index
    %6 = vector.load %arg9[%c0_5, %c0_6] : memref<64x384xf32, #tpu.memory_space<vmem>>, vector<64x384xf32>
    tpu.vector_store %arg9[%c0_5, %c0_6], %5 {strides = array<i32>} : memref<64x384xf32, #tpu.memory_space<vmem>>, vector<64x384xf32>,
    %c0_7 = arith.constant 0 : index
    %c0_8 = arith.constant 0 : index
    %7 = vector.load %arg4[%c0_7, %c0_8] : memref<128x384xf32, #tpu.memory_space<vmem>>, vector<128x384xf32>
    %c0_9 = arith.constant 0 : index
    %c0_10 = arith.constant 0 : index
    %8 = vector.load %arg5[%c0_9, %c0_10] : memref<1x128xf32, #tpu.memory_space<vmem>>, vector<1x128xf32>
    %9 = vector.shape_cast %8 : vector<1x128xf32> to vector<1x128xf32>
    %10 = vector.broadcast %9 : vector<1x128xf32> to vector<8x128xf32>
    %11 = tpu.iota {dimensions = array<i32: 1>} : vector<8x384xi32>
    %c128_i32 = arith.constant 128 : i32
    %c0_i32 = arith.constant 0 : i32
    %12 = arith.cmpi eq, %c128_i32, %c0_i32 : i32
    %c1_i32 = arith.constant 1 : i32
    %13 = arith.select %12, %c1_i32, %c128_i32 : i32
    %14 = vector.broadcast %13 : i32 to vector<8x384xi32>
    %15 = arith.remsi %11, %14 : vector<8x384xi32>
    %c0_i32_11 = arith.constant 0 : i32
    %16 = vector.broadcast %c0_i32_11 : i32 to vector<8x384xi32>
    %17 = arith.cmpi ne, %15, %16 : vector<8x384xi32>
    %c0_i32_12 = arith.constant 0 : i32
    %18 = vector.broadcast %c0_i32_12 : i32 to vector<8x384xi32>
    %19 = arith.cmpi slt, %15, %18 : vector<8x384xi32>
    %c0_i32_13 = arith.constant 0 : i32
    %20 = arith.cmpi slt, %13, %c0_i32_13 : i32
    %21 = vector.broadcast %20 : i1 to vector<8x384xi1>
    %22 = vector.broadcast %21 : vector<8x384xi1> to vector<8x384xi1>
    %23 = arith.xori %19, %22 : vector<8x384xi1>
    %24 = arith.andi %23, %17 : vector<8x384xi1>
    %25 = vector.broadcast %13 : i32 to vector<8x384xi32>
    %26 = arith.addi %15, %25 : vector<8x384xi32>
    %27 = arith.select %24, %26, %15 : vector<8x384xi1>, vector<8x384xi32>
    %c32_i32 = arith.constant 32 : i32
    %28 = vector.broadcast %c32_i32 : i32 to vector<8x384xi32>
    %29 = arith.cmpi slt, %27, %28 : vector<8x384xi32>
    %c0_14 = arith.constant 0 : index
    %c0_15 = arith.constant 0 : index
    %30 = vector.load %arg1[%c0_14, %c0_15] : memref<8x128xf32, #tpu.memory_space<vmem>>, vector<8x128xf32>
    %c0_16 = arith.constant 0 : index
    %c0_17 = arith.constant 0 : index
    %31 = vector.load %arg9[%c0_16, %c0_17] : memref<64x384xf32, #tpu.memory_space<vmem>>, vector<8x384xf32>
    %c56 = arith.constant 56 : index
    %c0_18 = arith.constant 0 : index
    %32 = vector.load %arg9[%c56, %c0_18] : memref<64x384xf32, #tpu.memory_space<vmem>>, vector<8x384xf32>
    %33 = arith.select %29, %31, %32 : vector<8x384xi1>, vector<8x384xf32>
    %cst_19 = arith.constant dense<0.000000e+00> : vector<8x384xf32>
    %34 = tpu.matmul %30, %7, %cst_19 {dimension_numbers = #tpu.dot_dimension_numbers<[1], [0], [0], [1], [0, 0, 1, 1], [], []>} : vector<8x128xf32>, vector<128x384xf32>, vector<8x384xf32> -> vector<8x384xf32>
    %35 = vector.extract_strided_slice %33 {offsets = [0, 0], sizes = [8, 128], strides = [1, 1]} : vector<8x384xf32> to vector<8x128xf32>
    %36 = vector.extract_strided_slice %34 {offsets = [0, 0], sizes = [8, 128], strides = [1, 1]} : vector<8x384xf32> to vector<8x128xf32>
    %37 = arith.addf %35, %36 : vector<8x128xf32>
    %38 = arith.negf %37 : vector<8x128xf32>
    %39 = math.exp %38 : vector<8x128xf32>
    %cst_20 = arith.constant 1.000000e+00 : f32
    %40 = vector.broadcast %cst_20 : f32 to vector<8x128xf32>
    %41 = arith.addf %40, %39 : vector<8x128xf32>
    %42 = arith.divf %40, %41 : vector<8x128xf32>
    %43 = vector.extract_strided_slice %33 {offsets = [0, 128], sizes = [8, 128], strides = [1, 1]} : vector<8x384xf32> to vector<8x128xf32>
    %44 = vector.extract_strided_slice %34 {offsets = [0, 128], sizes = [8, 128], strides = [1, 1]} : vector<8x384xf32> to vector<8x128xf32>
    %45 = arith.addf %43, %44 : vector<8x128xf32>
    %46 = arith.negf %45 : vector<8x128xf32>
    %47 = math.exp %46 : vector<8x128xf32>
    %cst_21 = arith.constant 1.000000e+00 : f32
    %48 = vector.broadcast %cst_21 : f32 to vector<8x128xf32>
    %49 = arith.addf %48, %47 : vector<8x128xf32>
    %50 = arith.divf %48, %49 : vector<8x128xf32>
    %51 = vector.extract_strided_slice %33 {offsets = [0, 256], sizes = [8, 128], strides = [1, 1]} : vector<8x384xf32> to vector<8x128xf32>
    %52 = vector.extract_strided_slice %34 {offsets = [0, 256], sizes = [8, 128], strides = [1, 1]} : vector<8x384xf32> to vector<8x128xf32>
    %53 = arith.addf %52, %10 : vector<8x128xf32>
    %54 = arith.mulf %42, %53 : vector<8x128xf32>
    %55 = arith.addf %51, %54 : vector<8x128xf32>
    %56 = math.tanh %55 : vector<8x128xf32>
    %57 = arith.subf %30, %56 : vector<8x128xf32>
    %58 = arith.mulf %50, %57 : vector<8x128xf32>
    %59 = arith.addf %56, %58 : vector<8x128xf32>
    %c0_22 = arith.constant 0 : index
    %c0_23 = arith.constant 0 : index
    %60 = vector.load %arg10[%c0_22, %c0_23] : memref<64x256xf32, #tpu.memory_space<vmem>>, vector<8x128xf32>
    tpu.vector_store %arg10[%c0_22, %c0_23], %59 {strides = array<i32>} : memref<64x256xf32, #tpu.memory_space<vmem>>, vector<8x128xf32>,
    %c56_24 = arith.constant 56 : index
    %c128 = arith.constant 128 : index
    %61 = vector.load %arg10[%c56_24, %c128] : memref<64x256xf32, #tpu.memory_space<vmem>>, vector<8x128xf32>
    tpu.vector_store %arg10[%c56_24, %c128], %59 {strides = array<i32>} : memref<64x256xf32, #tpu.memory_space<vmem>>, vector<8x128xf32>,
    %c8 = arith.constant 8 : index
    %c0_25 = arith.constant 0 : index
    %62 = vector.load %arg9[%c8, %c0_25] : memref<64x384xf32, #tpu.memory_space<vmem>>, vector<8x384xf32>
    %c48 = arith.constant 48 : index
    %c0_26 = arith.constant 0 : index
    %63 = vector.load %arg9[%c48, %c0_26] : memref<64x384xf32, #tpu.memory_space<vmem>>, vector<8x384xf32>
    %64 = arith.select %29, %62, %63 : vector<8x384xi1>, vector<8x384xf32>
    %cst_27 = arith.constant dense<0.000000e+00> : vector<8x384xf32>
    %65 = tpu.matmul %59, %7, %cst_27 {dimension_numbers = #tpu.dot_dimension_numbers<[1], [0], [0], [1], [0, 0, 1, 1], [], []>} : vector<8x128xf32>, vector<128x384xf32>, vector<8x384xf32> -> vector<8x384xf32>
    %66 = vector.extract_strided_slice %64 {offsets = [0, 0], sizes = [8, 128], strides = [1, 1]} : vector<8x384xf32> to vector<8x128xf32>
    %67 = vector.extract_strided_slice %65 {offsets = [0, 0], sizes = [8, 128], strides = [1, 1]} : vector<8x384xf32> to vector<8x128xf32>
    %68 = arith.addf %66, %67 : vector<8x128xf32>
    %69 = arith.negf %68 : vector<8x128xf32>
    %70 = math.exp %69 : vector<8x128xf32>
    %cst_28 = arith.constant 1.000000e+00 : f32
    %71 = vector.broadcast %cst_28 : f32 to vector<8x128xf32>
    %72 = arith.addf %71, %70 : vector<8x128xf32>
    %73 = arith.divf %71, %72 : vector<8x128xf32>
    %74 = vector.extract_strided_slice %64 {offsets = [0, 128], sizes = [8, 128], strides = [1, 1]} : vector<8x384xf32> to vector<8x128xf32>
    %75 = vector.extract_strided_slice %65 {offsets = [0, 128], sizes = [8, 128], strides = [1, 1]} : vector<8x384xf32> to vector<8x128xf32>
    %76 = arith.addf %74, %75 : vector<8x128xf32>
    %77 = arith.negf %76 : vector<8x128xf32>
    %78 = math.exp %77 : vector<8x128xf32>
    %cst_29 = arith.constant 1.000000e+00 : f32
    %79 = vector.broadcast %cst_29 : f32 to vector<8x128xf32>
    %80 = arith.addf %79, %78 : vector<8x128xf32>
    %81 = arith.divf %79, %80 : vector<8x128xf32>
    %82 = vector.extract_strided_slice %64 {offsets = [0, 256], sizes = [8, 128], strides = [1, 1]} : vector<8x384xf32> to vector<8x128xf32>
    %83 = vector.extract_strided_slice %65 {offsets = [0, 256], sizes = [8, 128], strides = [1, 1]} : vector<8x384xf32> to vector<8x128xf32>
    %84 = arith.addf %83, %10 : vector<8x128xf32>
    %85 = arith.mulf %73, %84 : vector<8x128xf32>
    %86 = arith.addf %82, %85 : vector<8x128xf32>
    %87 = math.tanh %86 : vector<8x128xf32>
    %88 = arith.subf %59, %87 : vector<8x128xf32>
    %89 = arith.mulf %81, %88 : vector<8x128xf32>
    %90 = arith.addf %87, %89 : vector<8x128xf32>
    %c8_30 = arith.constant 8 : index
    %c0_31 = arith.constant 0 : index
    %91 = vector.load %arg10[%c8_30, %c0_31] : memref<64x256xf32, #tpu.memory_space<vmem>>, vector<8x128xf32>
    tpu.vector_store %arg10[%c8_30, %c0_31], %90 {strides = array<i32>} : memref<64x256xf32, #tpu.memory_space<vmem>>, vector<8x128xf32>,
    %c48_32 = arith.constant 48 : index
    %c128_33 = arith.constant 128 : index
    %92 = vector.load %arg10[%c48_32, %c128_33] : memref<64x256xf32, #tpu.memory_space<vmem>>, vector<8x128xf32>
    tpu.vector_store %arg10[%c48_32, %c128_33], %90 {strides = array<i32>} : memref<64x256xf32, #tpu.memory_space<vmem>>, vector<8x128xf32>,
    %c16 = arith.constant 16 : index
    %c0_34 = arith.constant 0 : index
    %93 = vector.load %arg9[%c16, %c0_34] : memref<64x384xf32, #tpu.memory_space<vmem>>, vector<8x384xf32>
    %c40 = arith.constant 40 : index
    %c0_35 = arith.constant 0 : index
    %94 = vector.load %arg9[%c40, %c0_35] : memref<64x384xf32, #tpu.memory_space<vmem>>, vector<8x384xf32>
    %95 = arith.select %29, %93, %94 : vector<8x384xi1>, vector<8x384xf32>
    %cst_36 = arith.constant dense<0.000000e+00> : vector<8x384xf32>
    %96 = tpu.matmul %90, %7, %cst_36 {dimension_numbers = #tpu.dot_dimension_numbers<[1], [0], [0], [1], [0, 0, 1, 1], [], []>} : vector<8x128xf32>, vector<128x384xf32>, vector<8x384xf32> -> vector<8x384xf32>
    %97 = vector.extract_strided_slice %95 {offsets = [0, 0], sizes = [8, 128], strides = [1, 1]} : vector<8x384xf32> to vector<8x128xf32>
    %98 = vector.extract_strided_slice %96 {offsets = [0, 0], sizes = [8, 128], strides = [1, 1]} : vector<8x384xf32> to vector<8x128xf32>
    %99 = arith.addf %97, %98 : vector<8x128xf32>
    %100 = arith.negf %99 : vector<8x128xf32>
    %101 = math.exp %100 : vector<8x128xf32>
    %cst_37 = arith.constant 1.000000e+00 : f32
    %102 = vector.broadcast %cst_37 : f32 to vector<8x128xf32>
    %103 = arith.addf %102, %101 : vector<8x128xf32>
    %104 = arith.divf %102, %103 : vector<8x128xf32>
    %105 = vector.extract_strided_slice %95 {offsets = [0, 128], sizes = [8, 128], strides = [1, 1]} : vector<8x384xf32> to vector<8x128xf32>
    %106 = vector.extract_strided_slice %96 {offsets = [0, 128], sizes = [8, 128], strides = [1, 1]} : vector<8x384xf32> to vector<8x128xf32>
    %107 = arith.addf %105, %106 : vector<8x128xf32>
    %108 = arith.negf %107 : vector<8x128xf32>
    %109 = math.exp %108 : vector<8x128xf32>
    %cst_38 = arith.constant 1.000000e+00 : f32
    %110 = vector.broadcast %cst_38 : f32 to vector<8x128xf32>
    %111 = arith.addf %110, %109 : vector<8x128xf32>
    %112 = arith.divf %110, %111 : vector<8x128xf32>
    %113 = vector.extract_strided_slice %95 {offsets = [0, 256], sizes = [8, 128], strides = [1, 1]} : vector<8x384xf32> to vector<8x128xf32>
    %114 = vector.extract_strided_slice %96 {offsets = [0, 256], sizes = [8, 128], strides = [1, 1]} : vector<8x384xf32> to vector<8x128xf32>
    %115 = arith.addf %114, %10 : vector<8x128xf32>
    %116 = arith.mulf %104, %115 : vector<8x128xf32>
    %117 = arith.addf %113, %116 : vector<8x128xf32>
    %118 = math.tanh %117 : vector<8x128xf32>
    %119 = arith.subf %90, %118 : vector<8x128xf32>
    %120 = arith.mulf %112, %119 : vector<8x128xf32>
    %121 = arith.addf %118, %120 : vector<8x128xf32>
    %c16_39 = arith.constant 16 : index
    %c0_40 = arith.constant 0 : index
    %122 = vector.load %arg10[%c16_39, %c0_40] : memref<64x256xf32, #tpu.memory_space<vmem>>, vector<8x128xf32>
    tpu.vector_store %arg10[%c16_39, %c0_40], %121 {strides = array<i32>} : memref<64x256xf32, #tpu.memory_space<vmem>>, vector<8x128xf32>,
    %c40_41 = arith.constant 40 : index
    %c128_42 = arith.constant 128 : index
    %123 = vector.load %arg10[%c40_41, %c128_42] : memref<64x256xf32, #tpu.memory_space<vmem>>, vector<8x128xf32>
    tpu.vector_store %arg10[%c40_41, %c128_42], %121 {strides = array<i32>} : memref<64x256xf32, #tpu.memory_space<vmem>>, vector<8x128xf32>,
    %c24 = arith.constant 24 : index
    %c0_43 = arith.constant 0 : index
    %124 = vector.load %arg9[%c24, %c0_43] : memref<64x384xf32, #tpu.memory_space<vmem>>, vector<8x384xf32>
    %c32 = arith.constant 32 : index
    %c0_44 = arith.constant 0 : index
    %125 = vector.load %arg9[%c32, %c0_44] : memref<64x384xf32, #tpu.memory_space<vmem>>, vector<8x384xf32>
    %126 = arith.select %29, %124, %125 : vector<8x384xi1>, vector<8x384xf32>
    %cst_45 = arith.constant dense<0.000000e+00> : vector<8x384xf32>
    %127 = tpu.matmul %121, %7, %cst_45 {dimension_numbers = #tpu.dot_dimension_numbers<[1], [0], [0], [1], [0, 0, 1, 1], [], []>} : vector<8x128xf32>, vector<128x384xf32>, vector<8x384xf32> -> vector<8x384xf32>
    %128 = vector.extract_strided_slice %126 {offsets = [0, 0], sizes = [8, 128], strides = [1, 1]} : vector<8x384xf32> to vector<8x128xf32>
    %129 = vector.extract_strided_slice %127 {offsets = [0, 0], sizes = [8, 128], strides = [1, 1]} : vector<8x384xf32> to vector<8x128xf32>
    %130 = arith.addf %128, %129 : vector<8x128xf32>
    %131 = arith.negf %130 : vector<8x128xf32>
    %132 = math.exp %131 : vector<8x128xf32>
    %cst_46 = arith.constant 1.000000e+00 : f32
    %133 = vector.broadcast %cst_46 : f32 to vector<8x128xf32>
    %134 = arith.addf %133, %132 : vector<8x128xf32>
    %135 = arith.divf %133, %134 : vector<8x128xf32>
    %136 = vector.extract_strided_slice %126 {offsets = [0, 128], sizes = [8, 128], strides = [1, 1]} : vector<8x384xf32> to vector<8x128xf32>
    %137 = vector.extract_strided_slice %127 {offsets = [0, 128], sizes = [8, 128], strides = [1, 1]} : vector<8x384xf32> to vector<8x128xf32>
    %138 = arith.addf %136, %137 : vector<8x128xf32>
    %139 = arith.negf %138 : vector<8x128xf32>
    %140 = math.exp %139 : vector<8x128xf32>
    %cst_47 = arith.constant 1.000000e+00 : f32
    %141 = vector.broadcast %cst_47 : f32 to vector<8x128xf32>
    %142 = arith.addf %141, %140 : vector<8x128xf32>
    %143 = arith.divf %141, %142 : vector<8x128xf32>
    %144 = vector.extract_strided_slice %126 {offsets = [0, 256], sizes = [8, 128], strides = [1, 1]} : vector<8x384xf32> to vector<8x128xf32>
    %145 = vector.extract_strided_slice %127 {offsets = [0, 256], sizes = [8, 128], strides = [1, 1]} : vector<8x384xf32> to vector<8x128xf32>
    %146 = arith.addf %145, %10 : vector<8x128xf32>
    %147 = arith.mulf %135, %146 : vector<8x128xf32>
    %148 = arith.addf %144, %147 : vector<8x128xf32>
    %149 = math.tanh %148 : vector<8x128xf32>
    %150 = arith.subf %121, %149 : vector<8x128xf32>
    %151 = arith.mulf %143, %150 : vector<8x128xf32>
    %152 = arith.addf %149, %151 : vector<8x128xf32>
    %c24_48 = arith.constant 24 : index
    %c0_49 = arith.constant 0 : index
    %153 = vector.load %arg10[%c24_48, %c0_49] : memref<64x256xf32, #tpu.memory_space<vmem>>, vector<8x128xf32>
    tpu.vector_store %arg10[%c24_48, %c0_49], %152 {strides = array<i32>} : memref<64x256xf32, #tpu.memory_space<vmem>>, vector<8x128xf32>,
    %c32_50 = arith.constant 32 : index
    %c128_51 = arith.constant 128 : index
    %154 = vector.load %arg10[%c32_50, %c128_51] : memref<64x256xf32, #tpu.memory_space<vmem>>, vector<8x128xf32>
    tpu.vector_store %arg10[%c32_50, %c128_51], %152 {strides = array<i32>} : memref<64x256xf32, #tpu.memory_space<vmem>>, vector<8x128xf32>,
    %c32_52 = arith.constant 32 : index
    %c0_53 = arith.constant 0 : index
    %155 = vector.load %arg9[%c32_52, %c0_53] : memref<64x384xf32, #tpu.memory_space<vmem>>, vector<8x384xf32>
    %c24_54 = arith.constant 24 : index
    %c0_55 = arith.constant 0 : index
    %156 = vector.load %arg9[%c24_54, %c0_55] : memref<64x384xf32, #tpu.memory_space<vmem>>, vector<8x384xf32>
    %157 = arith.select %29, %155, %156 : vector<8x384xi1>, vector<8x384xf32>
    %cst_56 = arith.constant dense<0.000000e+00> : vector<8x384xf32>
    %158 = tpu.matmul %152, %7, %cst_56 {dimension_numbers = #tpu.dot_dimension_numbers<[1], [0], [0], [1], [0, 0, 1, 1], [], []>} : vector<8x128xf32>, vector<128x384xf32>, vector<8x384xf32> -> vector<8x384xf32>
    %159 = vector.extract_strided_slice %157 {offsets = [0, 0], sizes = [8, 128], strides = [1, 1]} : vector<8x384xf32> to vector<8x128xf32>
    %160 = vector.extract_strided_slice %158 {offsets = [0, 0], sizes = [8, 128], strides = [1, 1]} : vector<8x384xf32> to vector<8x128xf32>
    %161 = arith.addf %159, %160 : vector<8x128xf32>
    %162 = arith.negf %161 : vector<8x128xf32>
    %163 = math.exp %162 : vector<8x128xf32>
    %cst_57 = arith.constant 1.000000e+00 : f32
    %164 = vector.broadcast %cst_57 : f32 to vector<8x128xf32>
    %165 = arith.addf %164, %163 : vector<8x128xf32>
    %166 = arith.divf %164, %165 : vector<8x128xf32>
    %167 = vector.extract_strided_slice %157 {offsets = [0, 128], sizes = [8, 128], strides = [1, 1]} : vector<8x384xf32> to vector<8x128xf32>
    %168 = vector.extract_strided_slice %158 {offsets = [0, 128], sizes = [8, 128], strides = [1, 1]} : vector<8x384xf32> to vector<8x128xf32>
    %169 = arith.addf %167, %168 : vector<8x128xf32>
    %170 = arith.negf %169 : vector<8x128xf32>
    %171 = math.exp %170 : vector<8x128xf32>
    %cst_58 = arith.constant 1.000000e+00 : f32
    %172 = vector.broadcast %cst_58 : f32 to vector<8x128xf32>
    %173 = arith.addf %172, %171 : vector<8x128xf32>
    %174 = arith.divf %172, %173 : vector<8x128xf32>
    %175 = vector.extract_strided_slice %157 {offsets = [0, 256], sizes = [8, 128], strides = [1, 1]} : vector<8x384xf32> to vector<8x128xf32>
    %176 = vector.extract_strided_slice %158 {offsets = [0, 256], sizes = [8, 128], strides = [1, 1]} : vector<8x384xf32> to vector<8x128xf32>
    %177 = arith.addf %176, %10 : vector<8x128xf32>
    %178 = arith.mulf %166, %177 : vector<8x128xf32>
    %179 = arith.addf %175, %178 : vector<8x128xf32>
    %180 = math.tanh %179 : vector<8x128xf32>
    %181 = arith.subf %152, %180 : vector<8x128xf32>
    %182 = arith.mulf %174, %181 : vector<8x128xf32>
    %183 = arith.addf %180, %182 : vector<8x128xf32>
    %c32_59 = arith.constant 32 : index
    %c0_60 = arith.constant 0 : index
    %184 = vector.load %arg10[%c32_59, %c0_60] : memref<64x256xf32, #tpu.memory_space<vmem>>, vector<8x128xf32>
    tpu.vector_store %arg10[%c32_59, %c0_60], %183 {strides = array<i32>} : memref<64x256xf32, #tpu.memory_space<vmem>>, vector<8x128xf32>,
    %c24_61 = arith.constant 24 : index
    %c128_62 = arith.constant 128 : index
    %185 = vector.load %arg10[%c24_61, %c128_62] : memref<64x256xf32, #tpu.memory_space<vmem>>, vector<8x128xf32>
    tpu.vector_store %arg10[%c24_61, %c128_62], %183 {strides = array<i32>} : memref<64x256xf32, #tpu.memory_space<vmem>>, vector<8x128xf32>,
    %c40_63 = arith.constant 40 : index
    %c0_64 = arith.constant 0 : index
    %186 = vector.load %arg9[%c40_63, %c0_64] : memref<64x384xf32, #tpu.memory_space<vmem>>, vector<8x384xf32>
    %c16_65 = arith.constant 16 : index
    %c0_66 = arith.constant 0 : index
    %187 = vector.load %arg9[%c16_65, %c0_66] : memref<64x384xf32, #tpu.memory_space<vmem>>, vector<8x384xf32>
    %188 = arith.select %29, %186, %187 : vector<8x384xi1>, vector<8x384xf32>
    %cst_67 = arith.constant dense<0.000000e+00> : vector<8x384xf32>
    %189 = tpu.matmul %183, %7, %cst_67 {dimension_numbers = #tpu.dot_dimension_numbers<[1], [0], [0], [1], [0, 0, 1, 1], [], []>} : vector<8x128xf32>, vector<128x384xf32>, vector<8x384xf32> -> vector<8x384xf32>
    %190 = vector.extract_strided_slice %188 {offsets = [0, 0], sizes = [8, 128], strides = [1, 1]} : vector<8x384xf32> to vector<8x128xf32>
    %191 = vector.extract_strided_slice %189 {offsets = [0, 0], sizes = [8, 128], strides = [1, 1]} : vector<8x384xf32> to vector<8x128xf32>
    %192 = arith.addf %190, %191 : vector<8x128xf32>
    %193 = arith.negf %192 : vector<8x128xf32>
    %194 = math.exp %193 : vector<8x128xf32>
    %cst_68 = arith.constant 1.000000e+00 : f32
    %195 = vector.broadcast %cst_68 : f32 to vector<8x128xf32>
    %196 = arith.addf %195, %194 : vector<8x128xf32>
    %197 = arith.divf %195, %196 : vector<8x128xf32>
    %198 = vector.extract_strided_slice %188 {offsets = [0, 128], sizes = [8, 128], strides = [1, 1]} : vector<8x384xf32> to vector<8x128xf32>
    %199 = vector.extract_strided_slice %189 {offsets = [0, 128], sizes = [8, 128], strides = [1, 1]} : vector<8x384xf32> to vector<8x128xf32>
    %200 = arith.addf %198, %199 : vector<8x128xf32>
    %201 = arith.negf %200 : vector<8x128xf32>
    %202 = math.exp %201 : vector<8x128xf32>
    %cst_69 = arith.constant 1.000000e+00 : f32
    %203 = vector.broadcast %cst_69 : f32 to vector<8x128xf32>
    %204 = arith.addf %203, %202 : vector<8x128xf32>
    %205 = arith.divf %203, %204 : vector<8x128xf32>
    %206 = vector.extract_strided_slice %188 {offsets = [0, 256], sizes = [8, 128], strides = [1, 1]} : vector<8x384xf32> to vector<8x128xf32>
    %207 = vector.extract_strided_slice %189 {offsets = [0, 256], sizes = [8, 128], strides = [1, 1]} : vector<8x384xf32> to vector<8x128xf32>
    %208 = arith.addf %207, %10 : vector<8x128xf32>
    %209 = arith.mulf %197, %208 : vector<8x128xf32>
    %210 = arith.addf %206, %209 : vector<8x128xf32>
    %211 = math.tanh %210 : vector<8x128xf32>
    %212 = arith.subf %183, %211 : vector<8x128xf32>
    %213 = arith.mulf %205, %212 : vector<8x128xf32>
    %214 = arith.addf %211, %213 : vector<8x128xf32>
    %c40_70 = arith.constant 40 : index
    %c0_71 = arith.constant 0 : index
    %215 = vector.load %arg10[%c40_70, %c0_71] : memref<64x256xf32, #tpu.memory_space<vmem>>, vector<8x128xf32>
    tpu.vector_store %arg10[%c40_70, %c0_71], %214 {strides = array<i32>} : memref<64x256xf32, #tpu.memory_space<vmem>>, vector<8x128xf32>,
    %c16_72 = arith.constant 16 : index
    %c128_73 = arith.constant 128 : index
    %216 = vector.load %arg10[%c16_72, %c128_73] : memref<64x256xf32, #tpu.memory_space<vmem>>, vector<8x128xf32>
    tpu.vector_store %arg10[%c16_72, %c128_73], %214 {strides = array<i32>} : memref<64x256xf32, #tpu.memory_space<vmem>>, vector<8x128xf32>,
    %c48_74 = arith.constant 48 : index
    %c0_75 = arith.constant 0 : index
    %217 = vector.load %arg9[%c48_74, %c0_75] : memref<64x384xf32, #tpu.memory_space<vmem>>, vector<8x384xf32>
    %c8_76 = arith.constant 8 : index
    %c0_77 = arith.constant 0 : index
    %218 = vector.load %arg9[%c8_76, %c0_77] : memref<64x384xf32, #tpu.memory_space<vmem>>, vector<8x384xf32>
    %219 = arith.select %29, %217, %218 : vector<8x384xi1>, vector<8x384xf32>
    %cst_78 = arith.constant dense<0.000000e+00> : vector<8x384xf32>
    %220 = tpu.matmul %214, %7, %cst_78 {dimension_numbers = #tpu.dot_dimension_numbers<[1], [0], [0], [1], [0, 0, 1, 1], [], []>} : vector<8x128xf32>, vector<128x384xf32>, vector<8x384xf32> -> vector<8x384xf32>
    %221 = vector.extract_strided_slice %219 {offsets = [0, 0], sizes = [8, 128], strides = [1, 1]} : vector<8x384xf32> to vector<8x128xf32>
    %222 = vector.extract_strided_slice %220 {offsets = [0, 0], sizes = [8, 128], strides = [1, 1]} : vector<8x384xf32> to vector<8x128xf32>
    %223 = arith.addf %221, %222 : vector<8x128xf32>
    %224 = arith.negf %223 : vector<8x128xf32>
    %225 = math.exp %224 : vector<8x128xf32>
    %cst_79 = arith.constant 1.000000e+00 : f32
    %226 = vector.broadcast %cst_79 : f32 to vector<8x128xf32>
    %227 = arith.addf %226, %225 : vector<8x128xf32>
    %228 = arith.divf %226, %227 : vector<8x128xf32>
    %229 = vector.extract_strided_slice %219 {offsets = [0, 128], sizes = [8, 128], strides = [1, 1]} : vector<8x384xf32> to vector<8x128xf32>
    %230 = vector.extract_strided_slice %220 {offsets = [0, 128], sizes = [8, 128], strides = [1, 1]} : vector<8x384xf32> to vector<8x128xf32>
    %231 = arith.addf %229, %230 : vector<8x128xf32>
    %232 = arith.negf %231 : vector<8x128xf32>
    %233 = math.exp %232 : vector<8x128xf32>
    %cst_80 = arith.constant 1.000000e+00 : f32
    %234 = vector.broadcast %cst_80 : f32 to vector<8x128xf32>
    %235 = arith.addf %234, %233 : vector<8x128xf32>
    %236 = arith.divf %234, %235 : vector<8x128xf32>
    %237 = vector.extract_strided_slice %219 {offsets = [0, 256], sizes = [8, 128], strides = [1, 1]} : vector<8x384xf32> to vector<8x128xf32>
    %238 = vector.extract_strided_slice %220 {offsets = [0, 256], sizes = [8, 128], strides = [1, 1]} : vector<8x384xf32> to vector<8x128xf32>
    %239 = arith.addf %238, %10 : vector<8x128xf32>
    %240 = arith.mulf %228, %239 : vector<8x128xf32>
    %241 = arith.addf %237, %240 : vector<8x128xf32>
    %242 = math.tanh %241 : vector<8x128xf32>
    %243 = arith.subf %214, %242 : vector<8x128xf32>
    %244 = arith.mulf %236, %243 : vector<8x128xf32>
    %245 = arith.addf %242, %244 : vector<8x128xf32>
    %c48_81 = arith.constant 48 : index
    %c0_82 = arith.constant 0 : index
    %246 = vector.load %arg10[%c48_81, %c0_82] : memref<64x256xf32, #tpu.memory_space<vmem>>, vector<8x128xf32>
    tpu.vector_store %arg10[%c48_81, %c0_82], %245 {strides = array<i32>} : memref<64x256xf32, #tpu.memory_space<vmem>>, vector<8x128xf32>,
    %c8_83 = arith.constant 8 : index
    %c128_84 = arith.constant 128 : index
    %247 = vector.load %arg10[%c8_83, %c128_84] : memref<64x256xf32, #tpu.memory_space<vmem>>, vector<8x128xf32>
    tpu.vector_store %arg10[%c8_83, %c128_84], %245 {strides = array<i32>} : memref<64x256xf32, #tpu.memory_space<vmem>>, vector<8x128xf32>,
    %c56_85 = arith.constant 56 : index
    %c0_86 = arith.constant 0 : index
    %248 = vector.load %arg9[%c56_85, %c0_86] : memref<64x384xf32, #tpu.memory_space<vmem>>, vector<8x384xf32>
    %c0_87 = arith.constant 0 : index
    %c0_88 = arith.constant 0 : index
    %249 = vector.load %arg9[%c0_87, %c0_88] : memref<64x384xf32, #tpu.memory_space<vmem>>, vector<8x384xf32>
    %250 = arith.select %29, %248, %249 : vector<8x384xi1>, vector<8x384xf32>
    %cst_89 = arith.constant dense<0.000000e+00> : vector<8x384xf32>
    %251 = tpu.matmul %245, %7, %cst_89 {dimension_numbers = #tpu.dot_dimension_numbers<[1], [0], [0], [1], [0, 0, 1, 1], [], []>} : vector<8x128xf32>, vector<128x384xf32>, vector<8x384xf32> -> vector<8x384xf32>
    %252 = vector.extract_strided_slice %250 {offsets = [0, 0], sizes = [8, 128], strides = [1, 1]} : vector<8x384xf32> to vector<8x128xf32>
    %253 = vector.extract_strided_slice %251 {offsets = [0, 0], sizes = [8, 128], strides = [1, 1]} : vector<8x384xf32> to vector<8x128xf32>
    %254 = arith.addf %252, %253 : vector<8x128xf32>
    %255 = arith.negf %254 : vector<8x128xf32>
    %256 = math.exp %255 : vector<8x128xf32>
    %cst_90 = arith.constant 1.000000e+00 : f32
    %257 = vector.broadcast %cst_90 : f32 to vector<8x128xf32>
    %258 = arith.addf %257, %256 : vector<8x128xf32>
    %259 = arith.divf %257, %258 : vector<8x128xf32>
    %260 = vector.extract_strided_slice %250 {offsets = [0, 128], sizes = [8, 128], strides = [1, 1]} : vector<8x384xf32> to vector<8x128xf32>
    %261 = vector.extract_strided_slice %251 {offsets = [0, 128], sizes = [8, 128], strides = [1, 1]} : vector<8x384xf32> to vector<8x128xf32>
    %262 = arith.addf %260, %261 : vector<8x128xf32>
    %263 = arith.negf %262 : vector<8x128xf32>
    %264 = math.exp %263 : vector<8x128xf32>
    %cst_91 = arith.constant 1.000000e+00 : f32
    %265 = vector.broadcast %cst_91 : f32 to vector<8x128xf32>
    %266 = arith.addf %265, %264 : vector<8x128xf32>
    %267 = arith.divf %265, %266 : vector<8x128xf32>
    %268 = vector.extract_strided_slice %250 {offsets = [0, 256], sizes = [8, 128], strides = [1, 1]} : vector<8x384xf32> to vector<8x128xf32>
    %269 = vector.extract_strided_slice %251 {offsets = [0, 256], sizes = [8, 128], strides = [1, 1]} : vector<8x384xf32> to vector<8x128xf32>
    %270 = arith.addf %269, %10 : vector<8x128xf32>
    %271 = arith.mulf %259, %270 : vector<8x128xf32>
    %272 = arith.addf %268, %271 : vector<8x128xf32>
    %273 = math.tanh %272 : vector<8x128xf32>
    %274 = arith.subf %245, %273 : vector<8x128xf32>
    %275 = arith.mulf %267, %274 : vector<8x128xf32>
    %276 = arith.addf %273, %275 : vector<8x128xf32>
    %c56_92 = arith.constant 56 : index
    %c0_93 = arith.constant 0 : index
    %277 = vector.load %arg10[%c56_92, %c0_93] : memref<64x256xf32, #tpu.memory_space<vmem>>, vector<8x128xf32>
    tpu.vector_store %arg10[%c56_92, %c0_93], %276 {strides = array<i32>} : memref<64x256xf32, #tpu.memory_space<vmem>>, vector<8x128xf32>,
    %c0_94 = arith.constant 0 : index
    %c128_95 = arith.constant 128 : index
    %278 = vector.load %arg10[%c0_94, %c128_95] : memref<64x256xf32, #tpu.memory_space<vmem>>, vector<8x128xf32>
    tpu.vector_store %arg10[%c0_94, %c128_95], %276 {strides = array<i32>} : memref<64x256xf32, #tpu.memory_space<vmem>>, vector<8x128xf32>,
    %c0_96 = arith.constant 0 : index
    %c0_97 = arith.constant 0 : index
    %279 = vector.load %arg10[%c0_96, %c0_97] : memref<64x256xf32, #tpu.memory_space<vmem>>, vector<64x256xf32>
    %c0_98 = arith.constant 0 : index
    %c0_99 = arith.constant 0 : index
    %280 = vector.load %arg6[%c0_98, %c0_99] : memref<256x128xf32, #tpu.memory_space<vmem>>, vector<256x128xf32>
    %cst_100 = arith.constant dense<0.000000e+00> : vector<64x128xf32>
    %281 = tpu.matmul %279, %280, %cst_100 {dimension_numbers = #tpu.dot_dimension_numbers<[1], [0], [0], [1], [0, 0, 1, 1], [], []>} : vector<64x256xf32>, vector<256x128xf32>, vector<64x128xf32> -> vector<64x128xf32>
    %c0_101 = arith.constant 0 : index
    %c0_102 = arith.constant 0 : index
    %282 = vector.load %arg7[%c0_101, %c0_102] : memref<1x128xf32, #tpu.memory_space<vmem>>, vector<1x128xf32>
    %283 = vector.broadcast %282 : vector<1x128xf32> to vector<64x128xf32>
    %284 = arith.addf %281, %283 : vector<64x128xf32>
    %c0_103 = arith.constant 0 : index
    %c0_104 = arith.constant 0 : index
    %285 = vector.load %arg8[%c0_103, %c0_104] : memref<64x128xf32, #tpu.memory_space<vmem>>, vector<64x128xf32>
    tpu.vector_store %arg8[%c0_103, %c0_104], %284 {strides = array<i32>} : memref<64x128xf32, #tpu.memory_space<vmem>>, vector<64x128xf32>,
    return
  }
}

</mosaic_0001>

<bundles_post_ra>
// kernel: squeeze.2
= control target key start
LH: loop header
LB: loop body
LE: loop exit
PB: predicated region body
PF: predicated region fallthrough
CT: control target
= control target key end

     0   :  { %vm7_vm0 = vcmask 261120   ;;  %s39_s0 = inlined_call_operand.vmem [shape: f32[64], index: 0, kind: input, shape index: {}]   ;;  %s40_s1 = inlined_call_operand.vmem [shape: f32[2,32], index: 1, kind: output, shape index: {}]  }
   0x1   :  { %v4_v0 = vld [vmem:[%s39_s0] sm:$0x1]  ;;  %s22_s0 = smov 96  }
   0x2   :  { %5 = vst [vmem:[#allocation1] sm:$0x1] %v4_v0 }
   0x9   :  { %v9_v1 = vld [vmem:[#allocation1] sm:$0x1]  }
   0xa   :  { %v6_v2 = vld [vmem:[#allocation1] sm:$0x1]   ;;  %10 = vrot.lane.b32.xlu0 %v9_v1, %s22_s0 }
   0xb   :  { %8 = vst.msk [vmem:[#allocation0] sm:$0x1] %vm7_vm0, %v6_v2  }
  0x7c   :  { %v11_v3 = vpop.permute.xlu0 %10  }
  0x7d   :  { %14 = vst.msk [vmem:[#allocation0 + $0x1] sm:$0x1] %vm7_vm0, %v11_v3  }
  0x84   :  { %v18_v4 = vld [vmem:[#allocation0] sm:$0x3] }
  0x85   :  { %20 = vst [vmem:[%s40_s1] sm:$0x3] %v18_v4 }

// kernel: decoder_forward.1
= control target key start
LH: loop header
LB: loop body
LE: loop exit
PB: predicated region body
PF: predicated region fallthrough
CT: control target
= control target key end

     0   :  { %13 = vsyncpa [#allocation5], 0  ;;  %s3979_s0 = inlined_call_operand.vmem [shape: f32[64,4], index: 0, kind: input, shape index: {}]   ;;  %s3980_s1 = inlined_call_operand.vmem [shape: f32[8,128], index: 1, kind: input, shape index: {}]   ;;  %s3981_s2 = inlined_call_operand.vmem [shape: f32[4,384], index: 2, kind: input, shape index: {}]   ;;  %s3982_s3 = inlined_call_operand.vmem [shape: f32[1,384], index: 3, kind: input, shape index: {}]   ;;  %s3983_s4 = inlined_call_operand.hbm [shape: f32[128,384], index: 4, kind: input, shape index: {}]   ;;  %s3984_s5 = inlined_call_operand.vmem [shape: f32[1,128], index: 5, kind: input, shape index: {}]   ;;  %s3985_s6 = inlined_call_operand.hbm [shape: f32[256,128], index: 6, kind: input, shape index: {}]   ;;  %s3986_s7 = inlined_call_operand.vmem [shape: f32[1,128], index: 7, kind: input, shape index: {}]   ;;  %s3987_s8 = inlined_call_operand.vmem [shape: f32[64,128], index: 8, kind: output, shape index: {}]  }
   0x1   :  { %14 = vsyncpa [#allocation7], 0  ;;  %s3168_s27 = smov [#allocation4]   ;;  %s3120_s9 = scalar_lea.hbm %s3983_s4, 6144 }
   0x2   :  { %s28_s28 = sshll.u32 %s3168_s27, 4  ;;  %p3121_p0 = scmp.ne.s32.totalorder %s3983_s4, %s3120_s9  ;;  %s29_s28 = int_to_ptr.vmem [resolvable:$true] %s28_s28 }
   0x3   :  { %p3124_p1 = scmp.lt.u32.totalorder %s3120_s9, %s3983_s4 }
   0x5   :  { %p3126_p2 = pnand %p3124_p1, %p3121_p0 }
   0x7   :  { %3129 = shalt.err (!%p3126_p2)
}
   0x8   :  { %s3130_s14 = scalar_lea.vmem %s29_s28, 6144  ;;  %p3135_p4 = scmp.lt.s32.totalorder %s29_s28, %s29_s28 }
   0x9   :  { %p3131_p3 = scmp.ne.s32.totalorder %s29_s28, %s3130_s14  ;;  %p3136_p5 = scmp.lt.s32.totalorder %s3130_s14, %s3130_s14 }
   0xb   :  { %p3137_p6 = por %p3136_p5, %p3135_p4 }
   0xd   :  { %p3138_p7 = pnand %p3137_p6, %p3131_p3 }
   0xf   :  { %3141 = shalt.err (!%p3138_p7)
}
  0x10   :  { %s3169_s15 = smov 384   ;;  %s3170_s16 = smov 24  }
  0x11   :  { %34 = dma.hbm_to_vmem [thread:$0]  %s3983_s4, 6144, %s29_s28, [#allocation5], %s3169_s15, %s3169_s15, %s3170_s16  }
  0x12   :  { %s3171_s19 = smov [#allocation6]   ;;  %s3142_s23 = scalar_lea.hbm %s3985_s6, 4096 }
  0x13   :  { %s42_s20 = sshll.u32 %s3171_s19, 4  ;;  %p3143_p8 = scmp.ne.s32.totalorder %s3985_s6, %s3142_s23  ;;  %s43_s20 = int_to_ptr.vmem [resolvable:$true] %s42_s20 }
  0x14   :  { %p3146_p9 = scmp.lt.u32.totalorder %s3142_s23, %s3985_s6 }
  0x16   :  { %p3148_p10 = pnand %p3146_p9, %p3143_p8 }
  0x18   :  { %3151 = shalt.err (!%p3148_p10)
}
  0x19   :  { %s3152_s29 = scalar_lea.vmem %s43_s20, 4096  ;;  %p3157_p12 = scmp.lt.s32.totalorder %s43_s20, %s43_s20 }
  0x1a   :  { %p3153_p11 = scmp.ne.s32.totalorder %s43_s20, %s3152_s29  ;;  %p3158_p13 = scmp.lt.s32.totalorder %s3152_s29, %s3152_s29 }
  0x1c   :  { %p3159_p0 = por %p3158_p13, %p3157_p12 }
  0x1e   :  { %p3160_p1 = pnand %p3159_p0, %p3153_p11 }
  0x20   :  { %3163 = shalt.err (!%p3160_p1)
}
  0x21   :  { %s3172_s4 = smov 128   ;;  %s3173_s28 = smov 8  }
  0x22   :  { %48 = dma.hbm_to_vmem [thread:$0]  %s3985_s6, 4096, %s43_s20, [#allocation7], %s3172_s4, %s3172_s4, %s3173_s28  }
  0x23   :  { %3164 = dma.done.wait [#allocation5], 6144  }
  0x24   :  { %3165 = vsyncadd [#allocation5], 4294961152 }
  0x25   :  { %3166 = dma.done.wait [#allocation7], 4096  }
  0x26   :  { %3167 = vsyncadd [#allocation7], 4294963200  ;;  %v3988_v0 = vmov 0.0   ;;  %vm112_vm0 = vcmask 1043456   ;;  %vm87_vm1 = vcmask 31744   ;;  %v57_v2 = vld [vmem:[%s3979_s0] sm:$0xff] }
  0x27   :  { %183 = vmatprep.mubr.f32.mxu0 %v3988_v0  ;;  %v66_v1 = vld [vmem:[%s3981_s2 + $0x8] sm:$0xf]  ;;  %v65_v3 = vld [vmem:[%s3981_s2] sm:$0xff]  ;;  %2258 = vmatprep.mubr.msk.f32.mxu1 %vm87_vm1, %v57_v2  ;;  %v364_v10 = vld [vmem:[#allocation4 + $0x18] sm:$0xff]  ;;  %vm3176_vm2 = vmmov 0  }
  0x28   :  { %2256 = vmatprep.subr.msk.mxu1 %vm112_vm0, %v66_v1  ;;  %v86_v4 = vcombine.high %v65_v3, %v65_v3  ;;  %v58_v5 = vld [vmem:[%s3979_s0 + $0x8] sm:$0xff]  ;;  %v365_v7 = vld [vmem:[#allocation4 + $0x20] sm:$0xff]  ;;  %v59_v12 = vld [vmem:[%s3979_s0 + $0x10] sm:$0xff] }
  0x29   :  { %v362_v6 = vld [vmem:[#allocation4 + $0x8] sm:$0xff]  ;;  %2257 = vmatpush3.msk.msra.mxu1 %vm112_vm0, %v66_v1  ;;  %v361_v9 = vld [vmem:[#allocation4] sm:$0xff]  ;;  %v368_v13 = vld [vmem:[#allocation4 + $0x38] sm:$0xff]  ;;  %v3990_v1 = vmov 0.0|0.0  }
  0x2a   :  { %v3262_v8 = vpack.c.bf16 %v365_v7, %v362_v6  ;;  %2018 = vmatprep.subr.msk.mxu0 %vm112_vm0, %v86_v4  ;;  %2259 = vmatmul.mubr.msk.f32.vlgmr.msra.gmra.mrb[0].mxu1 %vm87_vm1, %v58_v5  ;;  %v3266_v11 = vpack.c.bf16 %v364_v10, %v361_v9  ;;  %v371_v14 = vld [vmem:[#allocation4 + $0x50] sm:$0xff]  ;;  %v60_v15 = vld [vmem:[%s3979_s0 + $0x18] sm:$0xff]  ;;  %v370_v18 = vld [vmem:[#allocation4 + $0x48] sm:$0xff] }
  0x2b   :  { %2019 = vmatpush1.msk.msra.mxu0 %vm112_vm0, %v65_v3  ;;  %v3276_v16 = vpack.c.bf16 %v371_v14, %v368_v13  ;;  %v367_v17 = vld [vmem:[#allocation4 + $0x30] sm:$0xff]  ;;  %v61_v20 = vld [vmem:[%s3979_s0 + $0x20] sm:$0xff]  ;;  %v374_v21 = vld [vmem:[#allocation4 + $0x68] sm:$0xff]  ;;  %2261 = vmatprep.mubr.msk.f32.mxu1 %vm87_vm1, %v59_v12 }
  0x2c   :  { %2551 = vmatprep.subr.bf16.mxu1 %v3262_v8  ;;  %2020 = vmatmul.mubr.msk.f32.vlgmr.msra.gmra.mrb[0].mxu0 %vm87_vm1, %v57_v2  ;;  %v3280_v19 = vpack.c.bf16 %v370_v18, %v367_v17  ;;  %v377_v22 = vld [vmem:[#allocation4 + $0x80] sm:$0xff]  ;;  %v376_v25 = vld [vmem:[#allocation4 + $0x78] sm:$0xff]  ;;  %v383_v27 = vld [vmem:[#allocation4 + $0xb0] sm:$0xff] }
  0x2d   :  { %2553 = vmatpush1.bf16.msra.mxu1 %v3266_v11  ;;  %v3287_v23 = vpack.c.bf16 %v377_v22, %v374_v21  ;;  %v373_v24 = vld [vmem:[#allocation4 + $0x60] sm:$0xff]  ;;  %189 = vmatprep.mubr.f32.mxu0 %v3988_v0  ;;  %v380_v26 = vld [vmem:[#allocation4 + $0x98] sm:$0xff]  ;;  %v62_v28 = vld [vmem:[%s3979_s0 + $0x28] sm:$0xff] }
  0x2e   :  { %2555 = vmatprep.subr.bf16.mxu1 %v3276_v16  ;;  %2262 = vmatmul.mubr.msk.f32.gmra.mrb[2].mxu1 %vm87_vm1, %v60_v15  ;;  %v3298_v29 = vpack.c.bf16 %v376_v25, %v373_v24  ;;  %v63_v30 = vld [vmem:[%s3979_s0 + $0x30] sm:$0xff]  ;;  %v3305_v31 = vpack.c.bf16 %v383_v27, %v380_v26  ;;  %v382_v33 = vld [vmem:[#allocation4 + $0xa8] sm:$0xff]  ;;  %v389_v35 = vld [vmem:[#allocation4 + $0xe0] sm:$0xff] }
  0x2f   :  { %2264 = vmatprep.mubr.msk.f32.mxu1 %vm87_vm1, %v61_v20  ;;  %2607 = vmatprep.subr.bf16.mxu0 %v3262_v8  ;;  %v379_v32 = vld [vmem:[#allocation4 + $0x90] sm:$0xff]  ;;  %v386_v34 = vld [vmem:[#allocation4 + $0xc8] sm:$0xff]  ;;  %v64_v36 = vld [vmem:[%s3979_s0 + $0x38] sm:$0xff] }
  0x30   :  { %2021 = vmatmul.mubr.msk.f32.gmra.mrb[2].mxu0 %vm87_vm1, %v58_v5  ;;  %v3316_v37 = vpack.c.bf16 %v382_v33, %v379_v32  ;;  %v3320_v38 = vpack.c.bf16 %v389_v35, %v386_v34  ;;  %v385_v39 = vld [vmem:[#allocation4 + $0xc0] sm:$0xff]  ;;  %v388_v40 = vld [vmem:[#allocation4 + $0xd8] sm:$0xff]  ;;  %v395_v42 = vld [vmem:[#allocation4 + $0x110] sm:$0xff] }
  0x31   :  { %2557 = vmatpush1.bf16.msra.mxu1 %v3280_v19  ;;  %195 = vmatprep.mubr.f32.mxu0 %v3988_v0  ;;  %v392_v41 = vld [vmem:[#allocation4 + $0xf8] sm:$0xff]  ;;  %v3328_v43 = vpack.c.bf16 %v388_v40, %v385_v39  ;;  %v391_v45 = vld [vmem:[#allocation4 + $0xf0] sm:$0xff]  ;;  %v394_v46 = vld [vmem:[#allocation4 + $0x108] sm:$0xff] }
  0x32   :  { %2559 = vmatprep.subr.bf16.mxu1 %v3287_v23  ;;  %2265 = vmatmul.mubr.msk.f32.gmra.mrb[4].mxu1 %vm87_vm1, %v62_v28  ;;  %v3332_v44 = vpack.c.bf16 %v395_v42, %v392_v41  ;;  %v398_v47 = vld [vmem:[#allocation4 + $0x128] sm:$0xff]  ;;  %v401_v48 = vld [vmem:[#allocation4 + $0x140] sm:$0xff]  ;;  %v3338_v49 = vpack.c.bf16 %v394_v46, %v391_v45  ;;  %v400_v52 = vld [vmem:[#allocation4 + $0x138] sm:$0xff] }
  0x33   :  { %2609 = vmatpush1.bf16.msra.mxu0 %v3266_v11  ;;  %2267 = vmatprep.mubr.msk.f32.mxu1 %vm87_vm1, %v63_v30  ;;  %v3342_v50 = vpack.c.bf16 %v401_v48, %v398_v47  ;;  %v397_v51 = vld [vmem:[#allocation4 + $0x120] sm:$0xff]  ;;  %v404_v53 = vld [vmem:[#allocation4 + $0x158] sm:$0xff]  ;;  %v407_v54 = vld [vmem:[#allocation4 + $0x170] sm:$0xff] }
  0x34   :  { %2611 = vmatprep.subr.bf16.mxu0 %v3276_v16  ;;  %2022 = vmatmul.mubr.msk.f32.gmra.mrb[4].mxu0 %vm87_vm1, %v59_v12  ;;  %v3348_v55 = vpack.c.bf16 %v400_v52, %v397_v51  ;;  %v3352_v56 = vpack.c.bf16 %v407_v54, %v404_v53  ;;  %v403_v57 = vld [vmem:[#allocation4 + $0x150] sm:$0xff]  ;;  %v406_v58 = vld [vmem:[#allocation4 + $0x168] sm:$0xff]  ;;  %v3369_v62 = vld [vmem:[%s3980_s1] sm:$0xff] }
  0x35   :  { %2561 = vmatpush1.bf16.msra.mxu1 %v3298_v29  ;;  %201 = vmatprep.mubr.f32.mxu0 %v3988_v0  ;;  %v3358_v59 = vpack.c.bf16 %v406_v58, %v403_v57  ;;  %v363_v60 = vld [vmem:[#allocation4 + $0x10] sm:$0xff]  ;;  %v366_v61 = vld [vmem:[#allocation4 + $0x28] sm:$0xff]  ;;  %v369_v2 = vld [vmem:[#allocation4 + $0x40] sm:$0xff] }
  0x36   :  { %2563 = vmatprep.subr.bf16.mxu1 %v3305_v31  ;;  %2268 = vmatmul.mubr.msk.f32.gmra.mrb[6].mxu1 %vm87_vm1, %v64_v36  ;;  %v3371_v63 = vpack.c.bf16 %v366_v61, %v363_v60  ;;  %v372_v3 = vld [vmem:[#allocation4 + $0x58] sm:$0xff]  ;;  %v375_v5 = vld [vmem:[#allocation4 + $0x70] sm:$0xff]  ;;  %v378_v6 = vld [vmem:[#allocation4 + $0x88] sm:$0xff] }
  0x37   :  { %2613 = vmatpush1.bf16.msra.mxu0 %v3280_v19  ;;  %533 = vmatprep.mubr.f32.mxu1 %v3988_v0  ;;  %v3379_v4 = vpack.c.bf16 %v372_v3, %v369_v2  ;;  %v3387_v7 = vpack.c.bf16 %v378_v6, %v375_v5  ;;  %v381_v9 = vld [vmem:[#allocation4 + $0xa0] sm:$0xff]  ;;  %v384_v10 = vld [vmem:[#allocation4 + $0xb8] sm:$0xff]  ;;  %v387_v13 = vld [vmem:[#allocation4 + $0xd0] sm:$0xff] }
  0x38   :  { %2615 = vmatprep.subr.bf16.mxu0 %v3287_v23  ;;  %2023 = vmatmul.mubr.msk.f32.gmra.mrb[6].mxu0 %vm87_vm1, %v60_v15  ;;  %v3391_v12 = vpack.c.bf16 %v384_v10, %v381_v9  ;;  %v390_v14 = vld [vmem:[#allocation4 + $0xe8] sm:$0xff]  ;;  %v393_v17 = vld [vmem:[#allocation4 + $0x100] sm:$0xff]  ;;  %v396_v18 = vld [vmem:[#allocation4 + $0x118] sm:$0xff] }
  0x39   :  { %2565 = vmatpush1.bf16.msra.mxu1 %v3316_v37  ;;  %207 = vmatprep.mubr.f32.mxu0 %v3988_v0  ;;  %v3395_v15 = vpack.c.bf16 %v390_v14, %v387_v13  ;;  %v399_v21 = vld [vmem:[#allocation4 + $0x130] sm:$0xff]  ;;  %v402_v22 = vld [vmem:[#allocation4 + $0x148] sm:$0xff]  ;;  %v405_v25 = vld [vmem:[#allocation4 + $0x160] sm:$0xff] }
  0x3a   :  { %2567 = vmatprep.subr.bf16.mxu1 %v3320_v38  ;;  %v3403_v24 = vpack.c.bf16 %v402_v22, %v399_v21  ;;  %v408_v26 = vld [vmem:[#allocation4 + $0x178] sm:$0xff]  ;;  %v67_v33 = vld [vmem:[%s3982_s3] sm:$0x7] }
  0x3b   :  { %2617 = vmatpush1.bf16.msra.mxu0 %v3298_v29  ;;  %v3407_v27 = vpack.c.bf16 %v408_v26, %v405_v25 }
  0x3c   :  { %2619 = vmatprep.subr.bf16.mxu0 %v3305_v31  ;;  %2024 = vmatmul.mubr.msk.f32.gmra.mrb[8].mxu0 %vm87_vm1, %v61_v20  ;;  %v3399_v20 = vpack.c.bf16 %v396_v18, %v393_v17 }
  0x3d   :  { %2569 = vmatpush1.bf16.msra.mxu1 %v3328_v43  ;;  %213 = vmatprep.mubr.f32.mxu0 %v3988_v0 }
  0x3e   :  { %2571 = vmatprep.subr.bf16.mxu1 %v3332_v44 }
  0x3f   :  { %2621 = vmatpush1.bf16.msra.mxu0 %v3316_v37 }
  0x40   :  { %2623 = vmatprep.subr.bf16.mxu0 %v3320_v38  ;;  %2025 = vmatmul.mubr.msk.f32.gmra.mrb[10].mxu0 %vm87_vm1, %v62_v28  ;;  %v69_v28 = vlaneseq }
  0x41   :  { %2573 = vmatpush1.bf16.msra.mxu1 %v3338_v49  ;;  %219 = vmatprep.mubr.f32.mxu0 %v3988_v0 }
  0x42   :  { %2575 = vmatprep.subr.bf16.mxu1 %v3342_v50  ;;  %v3434_v35 = vand.u32 127, %v69_v28 }
  0x43   :  { %2625 = vmatpush1.bf16.msra.mxu0 %v3328_v43 }
  0x44   :  { %2627 = vmatprep.subr.bf16.mxu0 %v3332_v44  ;;  %2026 = vmatmul.mubr.msk.f32.gmra.mrb[12].mxu0 %vm87_vm1, %v63_v30  ;;  %v70_v30 = vshrl.u32 %v69_v28, 7  ;;  %v419_v46 = vadd.s32 256, %v3434_v35  ;;  %v418_v25 = vadd.s32 128, %v3434_v35  ;;  %vm456_vm4 = vcmp.lt.s32.totalorder %v3434_v35, 32 }
  0x45   :  { %2577 = vmatpush1.bf16.msra.mxu1 %v3348_v55  ;;  %225 = vmatprep.mubr.f32.mxu0 %v3988_v0 }
  0x46   :  { %2579 = vmatprep.subr.bf16.mxu1 %v3352_v56  ;;  %v79_v32 = vsub.s32 2, %v70_v30  ;;  %v71_v41 = vsub.s32 0, %v70_v30  ;;  %v75_v45 = vsub.s32 1, %v70_v30  ;;  %v438_v60 = vand.u32 127, %v419_v46 }
  0x47   :  { %2629 = vmatpush1.bf16.msra.mxu0 %v3338_v49 }
  0x48   :  { %2631 = vmatprep.subr.bf16.mxu0 %v3342_v50  ;;  %2027 = vmatmul.mubr.msk.f32.gmra.mrb[14].mxu0 %vm87_vm1, %v64_v36  ;;  %v80_v34 = vrot.slane %v67_v33, %v79_v32  ;;  %v3443_v51 = vrot.slane %v67_v33, %v71_v41  ;;  %v3447_v54 = vrot.slane %v67_v33, %v75_v45  ;;  %vm3457_vm3 = vcmp.lt.s32.totalorder %v438_v60, 32 }
  0x49   :  { %2581 = vmatpush1.bf16.msra.mxu1 %v3358_v59  ;;  %706 = vmatprep.mubr.f32.mxu0 %v3988_v0  ;;  %v431_v60 = vand.u32 127, %v418_v25 }
  0x4a   :  { %2582 = vmatprep.subr.bf16.mxu1 %v3990_v1 }
  0x4b   :  { %2633 = vmatpush1.bf16.msra.mxu0 %v3348_v55  ;;  %vm3512_vm5 = vcmp.lt.s32.totalorder %v431_v60, 32 }
  0x4c   :  { %534 = vmatmul.mubr.f32.vlgmr.msra.gmra.mrb[8].mxu1 %v3369_v62  ;;  %2635 = vmatprep.subr.bf16.mxu0 %v3352_v56 }
  0x4d   :  { %2584 = vmatpush3.bf16.msra.mxu1 %v3371_v63  ;;  %2302 = vmatprep.mubr.msk.f32.mxu1 %vm3176_vm2, %v3988_v0 }
  0x4e   :  { %2585 = vmatprep.subr.bf16.mxu1 %v3990_v1 }
  0x4f   :  { %2637 = vmatpush1.bf16.msra.mxu0 %v3358_v59 }
  0x50   :  { %2663 = vmatprep.subr.bf16.mxu0 %v3262_v8 }
  0x51   :  { %2587 = vmatpush3.bf16.msra.mxu1 %v3379_v4 }
  0x52   :  { %2588 = vmatprep.subr.bf16.mxu1 %v3990_v1 }
  0x55   :  { %2590 = vmatpush3.bf16.msra.mxu1 %v3387_v7 }
  0x56   :  { %2591 = vmatprep.subr.bf16.mxu1 %v3990_v1 }
  0x59   :  { %2593 = vmatpush3.bf16.msra.mxu1 %v3391_v12 }
  0x5a   :  { %2594 = vmatprep.subr.bf16.mxu1 %v3990_v1 }
  0x5d   :  { %2596 = vmatpush3.bf16.msra.mxu1 %v3395_v15 }
  0x5e   :  { %2597 = vmatprep.subr.bf16.mxu1 %v3990_v1 }
  0x61   :  { %2599 = vmatpush3.bf16.msra.mxu1 %v3399_v20 }
  0x62   :  { %2600 = vmatprep.subr.bf16.mxu1 %v3990_v1 }
  0x65   :  { %2602 = vmatpush3.bf16.msra.mxu1 %v3403_v24 }
  0x66   :  { %2603 = vmatprep.subr.bf16.mxu1 %v3990_v1 }
  0x69   :  { %2605 = vmatpush3.bf16.msra.mxu1 %v3407_v27 }
  0x6a   :  { %2638 = vmatprep.subr.bf16.mxu1 %v3990_v1 }
  0x6c   :  { %2303 = vmatmul.mubr.f32.vlgmr.msra.gmra.mrb[10].mxu1 %v3369_v62 }
  0x6d   :  { %2640 = vmatpush3.bf16.msra.mxu1 %v3371_v63  ;;  %2337 = vmatprep.mubr.msk.f32.mxu1 %vm3176_vm2, %v3988_v0 }
  0x6e   :  { %2641 = vmatprep.subr.bf16.mxu1 %v3990_v1 }
  0x71   :  { %2643 = vmatpush3.bf16.msra.mxu1 %v3379_v4 }
  0x72   :  { %2644 = vmatprep.subr.bf16.mxu1 %v3990_v1 }
  0x75   :  { %2646 = vmatpush3.bf16.msra.mxu1 %v3387_v7 }
  0x76   :  { %2647 = vmatprep.subr.bf16.mxu1 %v3990_v1 }
  0x79   :  { %2649 = vmatpush3.bf16.msra.mxu1 %v3391_v12 }
  0x7a   :  { %2650 = vmatprep.subr.bf16.mxu1 %v3990_v1 }
  0x7d   :  { %2652 = vmatpush3.bf16.msra.mxu1 %v3395_v15 }
  0x7e   :  { %2653 = vmatprep.subr.bf16.mxu1 %v3990_v1 }
  0x81   :  { %2655 = vmatpush3.bf16.msra.mxu1 %v3399_v20 }
  0x82   :  { %2656 = vmatprep.subr.bf16.mxu1 %v3990_v1 }
  0x85   :  { %2658 = vmatpush3.bf16.msra.mxu1 %v3403_v24 }
  0x86   :  { %2659 = vmatprep.subr.bf16.mxu1 %v3990_v1 }
  0x89   :  { %2661 = vmatpush3.bf16.msra.mxu1 %v3407_v27 }
  0x8a   :  { %2694 = vmatprep.subr.bf16.mxu1 %v3990_v1 }
  0xfd   :  { %v2260_v36 = vpop.f32.mrb[0].mxu1 }
  0xfe   :  { %v3436_v39 = vadd.f32 %v2260_v36, %v80_v34  ;;  %v298_v40 = vpop.f32.mrb[1].mxu1 }
  0xff   :  { %v3438_v42 = vpop.f32.mrb[0].mxu0  ;;  %v3484_v33 = vadd.f32 %v298_v40, %v80_v34 }
 0x100   :  { %v3441_v47 = vpop.f32.mrb[1].mxu0 }
 0x101   :  { %v2263_v48 = vpop.f32.mrb[2].mxu1  ;;  %3997 = vst [vmem:[#allocation10_spill] sm:$0xff] %v3484_v33 }
 0x102   :  { %v3445_v52 = vadd.f32 %v2263_v48, %v80_v34  ;;  %v308_v53 = vpop.f32.mrb[3].mxu1 }
 0x103   :  { %v3449_v57 = vadd.f32 %v308_v53, %v80_v34  ;;  %v191_v58 = vpop.f32.mrb[2].mxu0 }
 0x104   :  { %v192_v61 = vadd.f32 %v191_v58, %v3443_v51  ;;  %v193_v2 = vpop.f32.mrb[3].mxu0 }
 0x105   :  { %v2266_v3 = vpop.f32.mrb[4].mxu1  ;;  %v3453_v5 = vadd.f32 %v193_v2, %v3447_v54 }
 0x106   :  { %v3455_v6 = vadd.f32 %v2266_v3, %v80_v34  ;;  %v318_v9 = vpop.f32.mrb[5].mxu1 }
 0x107   :  { %v3461_v13 = vadd.f32 %v318_v9, %v80_v34  ;;  %v197_v14 = vpop.f32.mrb[4].mxu0 }
 0x108   :  { %v198_v21 = vadd.f32 %v197_v14, %v3443_v51  ;;  %v199_v22 = vpop.f32.mrb[5].mxu0  ;;  %v4022_v25 = vld [vmem:[#allocation10_spill] sm:$0xff] }
 0x109   :  { %v2269_v30 = vpop.f32.mrb[6].mxu1  ;;  %v3482_v32 = vadd.f32 %v199_v22, %v3447_v54 }
 0x10a   :  { %v3486_v36 = vadd.f32 %v2269_v30, %v80_v34  ;;  %v328_v41 = vpop.f32.mrb[7].mxu1 }
 0x10b   :  { %v3488_v45 = vadd.f32 %v328_v41, %v80_v34  ;;  %v203_v46 = vpop.f32.mrb[6].mxu0 }
 0x10c   :  { %3998 = vst [vmem:[#allocation11_spill] sm:$0xff] %v3486_v36  ;;  %v204_v58 = vadd.f32 %v203_v46, %v3443_v51  ;;  %v205_v40 = vpop.f32.mrb[7].mxu0 }
 0x10d   :  { %v3508_v3 = vadd.f32 %v205_v40, %v3447_v54 }
 0x10f   :  { %v209_v9 = vpop.f32.mrb[8].mxu0 }
 0x110   :  { %v210_v14 = vadd.f32 %v209_v9, %v3443_v51  ;;  %v211_v22 = vpop.f32.mrb[9].mxu0 }
 0x111   :  { %v3517_v30 = vadd.f32 %v211_v22, %v3447_v54 }
 0x112   :  { %v3521_v41 = vsel %vm456_vm4, %v204_v58, %v210_v14  ;;  %v3525_v46 = vsel %vm456_vm4, %v210_v14, %v204_v58 }
 0x113   :  { %v215_v40 = vpop.f32.mrb[10].mxu0 }
 0x114   :  { %v216_v22 = vadd.f32 %v215_v40, %v3443_v51  ;;  %v217_v53 = vpop.f32.mrb[11].mxu0 }
 0x115   :  { %v3537_v2 = vadd.f32 %v217_v53, %v3447_v54 }
 0x116   :  { %v3541_v58 = vsel %vm456_vm4, %v198_v21, %v216_v22  ;;  %v3545_v14 = vsel %vm456_vm4, %v216_v22, %v198_v21 }
 0x117   :  { %v221_v18 = vpop.f32.mrb[12].mxu0 }
 0x118   :  { %v222_v40 = vadd.f32 %v221_v18, %v3443_v51  ;;  %v223_v9 = vpop.f32.mrb[13].mxu0 }
 0x119   :  { %v3557_v26 = vadd.f32 %v223_v9, %v3447_v54  ;;  %v186_v9 = vadd.f32 %v3438_v42, %v3443_v51 }
 0x11a   :  { %v3561_v21 = vsel %vm456_vm4, %v192_v61, %v222_v40  ;;  %v3565_v22 = vsel %vm456_vm4, %v222_v40, %v192_v61  ;;  %v3580_v61 = vadd.f32 %v3441_v47, %v3447_v54 }
 0x11b   :  { %v227_v60 = vpop.f32.mrb[14].mxu0 }
 0x11c   :  { %v228_v17 = vadd.f32 %v227_v60, %v3443_v51  ;;  %v229_v28 = vpop.f32.mrb[15].mxu0  ;;  %4001 = vst [vmem:[#allocation12_spill] sm:$0xff] %v3580_v61 }
 0x11d   :  { %v3583_v40 = vadd.f32 %v229_v28, %v3447_v54 }
 0x11e   :  { %v466_v34 = vsel %vm456_vm4, %v186_v9, %v228_v17  ;;  %v3589_v18 = vsel %vm456_vm4, %v228_v17, %v186_v9  ;;  %v3602_v17 = vld [vmem:[%s3984_s5] ss:$0 sm:$0xff] }
 0x11f   :  { %v535_v53 = vpop.f32.mrb[8].mxu1  ;;  %4002 = vst [vmem:[#allocation13_spill] sm:$0xff] %v3589_v18  ;;  %v467_v42 = vsel %vm3512_vm5, %v3580_v61, %v3583_v40 }
 0x120   :  { %v610_v0 = vadd.f32 %v535_v53, %v466_v34  ;;  %v537_v51 = vpop.f32.mrb[9].mxu1 }
 0x121   :  { %v617_v54 = vadd.f32 %v537_v51, %v467_v42 }
 0x122   :  { %v2038_v28 = vmul.f32 -1.442695, %v610_v0  ;;  %v4003_v0 = vsel %vm3457_vm3, %v3484_v33, %v3486_v36 }
 0x123   :  { %v2039_v1 = vmul.f32 -1.442695, %v617_v54 }
 0x124   :  { %3040 = vpow2.f32 %v2038_v28 }
 0x125   :  { %3042 = vpow2.f32 %v2039_v1 }
 0x12e   :  { %v3041_v60 = vpop.eup %3040 }
 0x12f   :  { %v614_v35 = vadd.f32 1.0, %v3041_v60  ;;  %v3043_v53 = vpop.eup %3042 }
 0x130   :  { %v621_v42 = vadd.f32 1.0, %v3043_v53 }
 0x131   :  { %3044 = vrcp.f32 %v614_v35 }
 0x13b   :  { %v3045_v18 = vpop.eup %3044 }
 0x13f   :  { %v606_v34 = vpop.f32.mrb[10].mxu1 }
 0x140   :  { %v624_v9 = vadd.f32 %v3602_v17, %v606_v34  ;;  %v2304_v48 = vpop.f32.mrb[11].mxu1 }
 0x141   :  { %v4004_v48 = vmov 0.0|0.0  }
 0x142   :  { %v625_v47 = vmul.f32 %v3045_v18, %v624_v9  ;;  %v4005_v18 = vmov 0.0  }
 0x144   :  { %v626_v1 = vadd.f32 %v625_v47, %v4003_v0 }
 0x146   :  { %3046 = vtanh.f32 %v626_v1 }
 0x147   :  { %3048 = vrcp.f32 %v621_v42  ;;  %v4006_v42 = vsel %vm3512_vm5, %v3453_v5, %v3557_v26 }
 0x150   :  { %v3047_v51 = vpop.eup %3046 }
 0x151   :  { %v628_v54 = vsub.f32 %v3369_v62, %v3047_v51  ;;  %v3049_v28 = vpop.eup %3048 }
 0x153   :  { %v629_v60 = vmul.f32 %v3049_v28, %v628_v54 }
 0x155   :  { %v3611_v35 = vadd.f32 %v3047_v51, %v629_v60 }
 0x157   :  { %707 = vmatmul.mubr.f32.vlgmr.msra.gmra.mrb[16].mxu0 %v3611_v35  ;;  %2338 = vmatmul.mubr.f32.vlgmr.msra.gmra.mrb[12].mxu1 %v3611_v35 }
 0x158   :  { %2665 = vmatpush1.bf16.msra.mxu0 %v3266_v11  ;;  %2696 = vmatpush3.bf16.msra.mxu1 %v3371_v63 }
 0x159   :  { %2667 = vmatprep.subr.bf16.mxu0 %v3276_v16  ;;  %2697 = vmatprep.subr.bf16.mxu1 %v4004_v48 }
 0x15a   :  { %879 = vmatprep.mubr.f32.mxu0 %v4005_v18  ;;  %2372 = vmatprep.mubr.msk.f32.mxu1 %vm3176_vm2, %v4005_v18 }
 0x15c   :  { %2669 = vmatpush1.bf16.msra.mxu0 %v3280_v19  ;;  %2699 = vmatpush3.bf16.msra.mxu1 %v3379_v4 }
 0x15d   :  { %2671 = vmatprep.subr.bf16.mxu0 %v3287_v23  ;;  %2700 = vmatprep.subr.bf16.mxu1 %v4004_v48 }
 0x160   :  { %2673 = vmatpush1.bf16.msra.mxu0 %v3298_v29  ;;  %2702 = vmatpush3.bf16.msra.mxu1 %v3387_v7 }
 0x161   :  { %2675 = vmatprep.subr.bf16.mxu0 %v3305_v31  ;;  %2703 = vmatprep.subr.bf16.mxu1 %v4004_v48 }
 0x164   :  { %2677 = vmatpush1.bf16.msra.mxu0 %v3316_v37  ;;  %2705 = vmatpush3.bf16.msra.mxu1 %v3391_v12 }
 0x165   :  { %2679 = vmatprep.subr.bf16.mxu0 %v3320_v38  ;;  %2706 = vmatprep.subr.bf16.mxu1 %v4004_v48 }
 0x168   :  { %2681 = vmatpush1.bf16.msra.mxu0 %v3328_v43  ;;  %2708 = vmatpush3.bf16.msra.mxu1 %v3395_v15 }
 0x169   :  { %2683 = vmatprep.subr.bf16.mxu0 %v3332_v44  ;;  %2709 = vmatprep.subr.bf16.mxu1 %v4004_v48 }
 0x16c   :  { %2685 = vmatpush1.bf16.msra.mxu0 %v3338_v49  ;;  %2711 = vmatpush3.bf16.msra.mxu1 %v3399_v20 }
 0x16d   :  { %2687 = vmatprep.subr.bf16.mxu0 %v3342_v50  ;;  %2712 = vmatprep.subr.bf16.mxu1 %v4004_v48 }
 0x170   :  { %2689 = vmatpush1.bf16.msra.mxu0 %v3348_v55  ;;  %2714 = vmatpush3.bf16.msra.mxu1 %v3403_v24 }
 0x171   :  { %2691 = vmatprep.subr.bf16.mxu0 %v3352_v56  ;;  %2715 = vmatprep.subr.bf16.mxu1 %v4004_v48 }
 0x174   :  { %2693 = vmatpush1.bf16.msra.mxu0 %v3358_v59  ;;  %2717 = vmatpush3.bf16.msra.mxu1 %v3407_v27 }
 0x175   :  { %2719 = vmatprep.subr.bf16.mxu0 %v3262_v8  ;;  %2750 = vmatprep.subr.bf16.mxu1 %v4004_v48 }
 0x22a   :  { %v708_v62 = vpop.f32.mrb[16].mxu0  ;;  %v779_v47 = vpop.f32.mrb[12].mxu1 }
 0x22b   :  { %v783_v34 = vadd.f32 %v708_v62, %v3561_v21  ;;  %v710_v53 = vpop.f32.mrb[17].mxu0  ;;  %v2339_v9 = vpop.f32.mrb[13].mxu1  ;;  %v797_v33 = vadd.f32 %v3602_v17, %v779_v47  ;;  %v4007_v62 = vsel %vm3457_vm3, %v3436_v39, %v3488_v45 }
 0x22c   :  { %v790_v0 = vadd.f32 %v710_v53, %v4006_v42 }
 0x22d   :  { %v2040_v1 = vmul.f32 -1.442695, %v783_v34 }
 0x22e   :  { %v2041_v51 = vmul.f32 -1.442695, %v790_v0 }
 0x22f   :  { %3050 = vpow2.f32 %v2040_v1 }
 0x230   :  { %3052 = vpow2.f32 %v2041_v51 }
 0x239   :  { %v3051_v54 = vpop.eup %3050 }
 0x23a   :  { %v787_v28 = vadd.f32 1.0, %v3051_v54  ;;  %v3053_v60 = vpop.eup %3052  ;;  %v4008_v54 = vsel %vm3512_vm5, %v3482_v32, %v3537_v2 }
 0x23b   :  { %v794_v61 = vadd.f32 1.0, %v3053_v60 }
 0x23c   :  { %3054 = vrcp.f32 %v787_v28 }
 0x246   :  { %v3055_v36 = vpop.eup %3054 }
 0x247   :  { %v798_v21 = vmul.f32 %v3055_v36, %v797_v33 }
 0x249   :  { %v799_v9 = vadd.f32 %v798_v21, %v4007_v62 }
 0x24b   :  { %3056 = vtanh.f32 %v799_v9 }
 0x24c   :  { %3058 = vrcp.f32 %v794_v61 }
 0x255   :  { %v3057_v34 = vpop.eup %3056 }
 0x256   :  { %v801_v53 = vsub.f32 %v3611_v35, %v3057_v34  ;;  %v3059_v42 = vpop.eup %3058 }
 0x258   :  { %v802_v0 = vmul.f32 %v3059_v42, %v801_v53 }
 0x25a   :  { %v3663_v1 = vadd.f32 %v3057_v34, %v802_v0  ;;  %v4009_v0 = vsel %vm3457_vm3, %v3449_v57, %v3455_v6 }
 0x25c   :  { %880 = vmatmul.mubr.f32.vlgmr.msra.gmra.mrb[18].mxu0 %v3663_v1  ;;  %2373 = vmatmul.mubr.f32.vlgmr.msra.gmra.mrb[14].mxu1 %v3663_v1 }
 0x25d   :  { %2721 = vmatpush1.bf16.msra.mxu0 %v3266_v11  ;;  %2752 = vmatpush3.bf16.msra.mxu1 %v3371_v63 }
 0x25e   :  { %2723 = vmatprep.subr.bf16.mxu0 %v3276_v16  ;;  %2753 = vmatprep.subr.bf16.mxu1 %v4004_v48 }
 0x25f   :  { %1052 = vmatprep.mubr.f32.mxu0 %v4005_v18  ;;  %2407 = vmatprep.mubr.msk.f32.mxu1 %vm3176_vm2, %v4005_v18 }
 0x261   :  { %2725 = vmatpush1.bf16.msra.mxu0 %v3280_v19  ;;  %2755 = vmatpush3.bf16.msra.mxu1 %v3379_v4 }
 0x262   :  { %2727 = vmatprep.subr.bf16.mxu0 %v3287_v23  ;;  %2756 = vmatprep.subr.bf16.mxu1 %v4004_v48 }
 0x265   :  { %2729 = vmatpush1.bf16.msra.mxu0 %v3298_v29  ;;  %2758 = vmatpush3.bf16.msra.mxu1 %v3387_v7 }
 0x266   :  { %2731 = vmatprep.subr.bf16.mxu0 %v3305_v31  ;;  %2759 = vmatprep.subr.bf16.mxu1 %v4004_v48 }
 0x269   :  { %2733 = vmatpush1.bf16.msra.mxu0 %v3316_v37  ;;  %2761 = vmatpush3.bf16.msra.mxu1 %v3391_v12 }
 0x26a   :  { %2735 = vmatprep.subr.bf16.mxu0 %v3320_v38  ;;  %2762 = vmatprep.subr.bf16.mxu1 %v4004_v48 }
 0x26d   :  { %2737 = vmatpush1.bf16.msra.mxu0 %v3328_v43  ;;  %2764 = vmatpush3.bf16.msra.mxu1 %v3395_v15 }
 0x26e   :  { %2739 = vmatprep.subr.bf16.mxu0 %v3332_v44  ;;  %2765 = vmatprep.subr.bf16.mxu1 %v4004_v48 }
 0x271   :  { %2741 = vmatpush1.bf16.msra.mxu0 %v3338_v49  ;;  %2767 = vmatpush3.bf16.msra.mxu1 %v3399_v20 }
 0x272   :  { %2743 = vmatprep.subr.bf16.mxu0 %v3342_v50  ;;  %2768 = vmatprep.subr.bf16.mxu1 %v4004_v48 }
 0x275   :  { %2745 = vmatpush1.bf16.msra.mxu0 %v3348_v55  ;;  %2770 = vmatpush3.bf16.msra.mxu1 %v3403_v24 }
 0x276   :  { %2747 = vmatprep.subr.bf16.mxu0 %v3352_v56  ;;  %2771 = vmatprep.subr.bf16.mxu1 %v4004_v48 }
 0x279   :  { %2749 = vmatpush1.bf16.msra.mxu0 %v3358_v59  ;;  %2773 = vmatpush3.bf16.msra.mxu1 %v3407_v27 }
 0x27a   :  { %2775 = vmatprep.subr.bf16.mxu0 %v3262_v8  ;;  %2806 = vmatprep.subr.bf16.mxu1 %v4004_v48 }
 0x32f   :  { %v881_v33 = vpop.f32.mrb[18].mxu0  ;;  %v952_v36 = vpop.f32.mrb[14].mxu1 }
 0x330   :  { %v956_v61 = vadd.f32 %v881_v33, %v3541_v58  ;;  %v883_v47 = vpop.f32.mrb[19].mxu0  ;;  %v2374_v51 = vpop.f32.mrb[15].mxu1  ;;  %v970_v53 = vadd.f32 %v3602_v17, %v952_v36 }
 0x331   :  { %v963_v28 = vadd.f32 %v883_v47, %v4008_v54 }
 0x332   :  { %v2042_v60 = vmul.f32 -1.442695, %v956_v61 }
 0x333   :  { %v2043_v21 = vmul.f32 -1.442695, %v963_v28 }
 0x334   :  { %3060 = vpow2.f32 %v2042_v60 }
 0x335   :  { %3062 = vpow2.f32 %v2043_v21 }
 0x33e   :  { %v3061_v62 = vpop.eup %3060 }
 0x33f   :  { %v960_v9 = vadd.f32 1.0, %v3061_v62  ;;  %v3063_v34 = vpop.eup %3062 }
 0x340   :  { %v967_v51 = vadd.f32 1.0, %v3063_v34 }
 0x341   :  { %3064 = vrcp.f32 %v960_v9 }
 0x34b   :  { %v3065_v42 = vpop.eup %3064 }
 0x34c   :  { %v971_v58 = vmul.f32 %v3065_v42, %v970_v53  ;;  %v4010_v53 = vsel %vm3512_vm5, %v3508_v3, %v3517_v30 }
 0x34e   :  { %v972_v33 = vadd.f32 %v971_v58, %v4009_v0 }
 0x350   :  { %3066 = vtanh.f32 %v972_v33 }
 0x351   :  { %3068 = vrcp.f32 %v967_v51 }
 0x35a   :  { %v3067_v61 = vpop.eup %3066 }
 0x35b   :  { %v974_v47 = vsub.f32 %v3663_v1, %v3067_v61  ;;  %v3069_v54 = vpop.eup %3068 }
 0x35d   :  { %v975_v28 = vmul.f32 %v3069_v54, %v974_v47 }
 0x35f   :  { %v3715_v60 = vadd.f32 %v3067_v61, %v975_v28  ;;  %v4011_v28 = vsel %vm3457_vm3, %v3445_v52, %v3461_v13 }
 0x361   :  { %1053 = vmatmul.mubr.f32.vlgmr.msra.gmra.mrb[20].mxu0 %v3715_v60  ;;  %2408 = vmatmul.mubr.f32.vlgmr.msra.gmra.mrb[16].mxu1 %v3715_v60 }
 0x362   :  { %2777 = vmatpush1.bf16.msra.mxu0 %v3266_v11  ;;  %2808 = vmatpush3.bf16.msra.mxu1 %v3371_v63 }
 0x363   :  { %2779 = vmatprep.subr.bf16.mxu0 %v3276_v16  ;;  %2809 = vmatprep.subr.bf16.mxu1 %v4004_v48 }
 0x364   :  { %1225 = vmatprep.mubr.f32.mxu0 %v4005_v18  ;;  %2442 = vmatprep.mubr.msk.f32.mxu1 %vm3176_vm2, %v4005_v18 }
 0x366   :  { %2781 = vmatpush1.bf16.msra.mxu0 %v3280_v19  ;;  %2811 = vmatpush3.bf16.msra.mxu1 %v3379_v4 }
 0x367   :  { %2783 = vmatprep.subr.bf16.mxu0 %v3287_v23  ;;  %2812 = vmatprep.subr.bf16.mxu1 %v4004_v48 }
 0x36a   :  { %2785 = vmatpush1.bf16.msra.mxu0 %v3298_v29  ;;  %2814 = vmatpush3.bf16.msra.mxu1 %v3387_v7 }
 0x36b   :  { %2787 = vmatprep.subr.bf16.mxu0 %v3305_v31  ;;  %2815 = vmatprep.subr.bf16.mxu1 %v4004_v48 }
 0x36e   :  { %2789 = vmatpush1.bf16.msra.mxu0 %v3316_v37  ;;  %2817 = vmatpush3.bf16.msra.mxu1 %v3391_v12 }
 0x36f   :  { %2791 = vmatprep.subr.bf16.mxu0 %v3320_v38  ;;  %2818 = vmatprep.subr.bf16.mxu1 %v4004_v48 }
 0x372   :  { %2793 = vmatpush1.bf16.msra.mxu0 %v3328_v43  ;;  %2820 = vmatpush3.bf16.msra.mxu1 %v3395_v15 }
 0x373   :  { %2795 = vmatprep.subr.bf16.mxu0 %v3332_v44  ;;  %2821 = vmatprep.subr.bf16.mxu1 %v4004_v48 }
 0x376   :  { %2797 = vmatpush1.bf16.msra.mxu0 %v3338_v49  ;;  %2823 = vmatpush3.bf16.msra.mxu1 %v3399_v20 }
 0x377   :  { %2799 = vmatprep.subr.bf16.mxu0 %v3342_v50  ;;  %2824 = vmatprep.subr.bf16.mxu1 %v4004_v48 }
 0x37a   :  { %2801 = vmatpush1.bf16.msra.mxu0 %v3348_v55  ;;  %2826 = vmatpush3.bf16.msra.mxu1 %v3403_v24 }
 0x37b   :  { %2803 = vmatprep.subr.bf16.mxu0 %v3352_v56  ;;  %2827 = vmatprep.subr.bf16.mxu1 %v4004_v48 }
 0x37e   :  { %2805 = vmatpush1.bf16.msra.mxu0 %v3358_v59  ;;  %2829 = vmatpush3.bf16.msra.mxu1 %v3407_v27 }
 0x37f   :  { %2831 = vmatprep.subr.bf16.mxu0 %v3262_v8  ;;  %2862 = vmatprep.subr.bf16.mxu1 %v4004_v48 }
 0x434   :  { %v1054_v36 = vpop.f32.mrb[20].mxu0  ;;  %v1125_v21 = vpop.f32.mrb[16].mxu1 }
 0x435   :  { %v1129_v62 = vadd.f32 %v1054_v36, %v3521_v41  ;;  %v1056_v9 = vpop.f32.mrb[21].mxu0  ;;  %v2409_v34 = vpop.f32.mrb[17].mxu1  ;;  %v1143_v47 = vadd.f32 %v3602_v17, %v1125_v21 }
 0x436   :  { %v1136_v42 = vadd.f32 %v1056_v9, %v4010_v53 }
 0x437   :  { %v2044_v58 = vmul.f32 -1.442695, %v1129_v62 }
 0x438   :  { %v2045_v0 = vmul.f32 -1.442695, %v1136_v42 }
 0x439   :  { %3070 = vpow2.f32 %v2044_v58 }
 0x43a   :  { %3072 = vpow2.f32 %v2045_v0 }
 0x443   :  { %v3071_v33 = vpop.eup %3070 }
 0x444   :  { %v1133_v51 = vadd.f32 1.0, %v3071_v33  ;;  %v3073_v61 = vpop.eup %3072 }
 0x445   :  { %v1140_v34 = vadd.f32 1.0, %v3073_v61 }
 0x446   :  { %3074 = vrcp.f32 %v1133_v51 }
 0x450   :  { %v3075_v54 = vpop.eup %3074 }
 0x451   :  { %v1144_v41 = vmul.f32 %v3075_v54, %v1143_v47  ;;  %v4012_v47 = vsel %vm3512_vm5, %v3517_v30, %v3508_v3 }
 0x453   :  { %v1145_v36 = vadd.f32 %v1144_v41, %v4011_v28 }
 0x455   :  { %3076 = vtanh.f32 %v1145_v36 }
 0x456   :  { %3078 = vrcp.f32 %v1140_v34 }
 0x45f   :  { %v3077_v62 = vpop.eup %3076 }
 0x460   :  { %v1147_v9 = vsub.f32 %v3715_v60, %v3077_v62  ;;  %v3079_v53 = vpop.eup %3078 }
 0x462   :  { %v1148_v42 = vmul.f32 %v3079_v53, %v1147_v9 }
 0x464   :  { %v3767_v58 = vadd.f32 %v3077_v62, %v1148_v42  ;;  %v4013_v42 = vsel %vm3457_vm3, %v3461_v13, %v3445_v52 }
 0x466   :  { %1226 = vmatmul.mubr.f32.vlgmr.msra.gmra.mrb[22].mxu0 %v3767_v58  ;;  %2443 = vmatmul.mubr.f32.vlgmr.msra.gmra.mrb[18].mxu1 %v3767_v58 }
 0x467   :  { %2833 = vmatpush1.bf16.msra.mxu0 %v3266_v11  ;;  %2864 = vmatpush3.bf16.msra.mxu1 %v3371_v63 }
 0x468   :  { %2835 = vmatprep.subr.bf16.mxu0 %v3276_v16  ;;  %2865 = vmatprep.subr.bf16.mxu1 %v4004_v48 }
 0x469   :  { %1398 = vmatprep.mubr.f32.mxu0 %v4005_v18  ;;  %2477 = vmatprep.mubr.msk.f32.mxu1 %vm3176_vm2, %v4005_v18 }
 0x46b   :  { %2837 = vmatpush1.bf16.msra.mxu0 %v3280_v19  ;;  %2867 = vmatpush3.bf16.msra.mxu1 %v3379_v4 }
 0x46c   :  { %2839 = vmatprep.subr.bf16.mxu0 %v3287_v23  ;;  %2868 = vmatprep.subr.bf16.mxu1 %v4004_v48 }
 0x46f   :  { %2841 = vmatpush1.bf16.msra.mxu0 %v3298_v29  ;;  %2870 = vmatpush3.bf16.msra.mxu1 %v3387_v7 }
 0x470   :  { %2843 = vmatprep.subr.bf16.mxu0 %v3305_v31  ;;  %2871 = vmatprep.subr.bf16.mxu1 %v4004_v48 }
 0x473   :  { %2845 = vmatpush1.bf16.msra.mxu0 %v3316_v37  ;;  %2873 = vmatpush3.bf16.msra.mxu1 %v3391_v12 }
 0x474   :  { %2847 = vmatprep.subr.bf16.mxu0 %v3320_v38  ;;  %2874 = vmatprep.subr.bf16.mxu1 %v4004_v48 }
 0x477   :  { %2849 = vmatpush1.bf16.msra.mxu0 %v3328_v43  ;;  %2876 = vmatpush3.bf16.msra.mxu1 %v3395_v15 }
 0x478   :  { %2851 = vmatprep.subr.bf16.mxu0 %v3332_v44  ;;  %2877 = vmatprep.subr.bf16.mxu1 %v4004_v48 }
 0x47b   :  { %2853 = vmatpush1.bf16.msra.mxu0 %v3338_v49  ;;  %2879 = vmatpush3.bf16.msra.mxu1 %v3399_v20 }
 0x47c   :  { %2855 = vmatprep.subr.bf16.mxu0 %v3342_v50  ;;  %2880 = vmatprep.subr.bf16.mxu1 %v4004_v48 }
 0x47f   :  { %2857 = vmatpush1.bf16.msra.mxu0 %v3348_v55  ;;  %2882 = vmatpush3.bf16.msra.mxu1 %v3403_v24 }
 0x480   :  { %2859 = vmatprep.subr.bf16.mxu0 %v3352_v56  ;;  %2883 = vmatprep.subr.bf16.mxu1 %v4004_v48 }
 0x483   :  { %2861 = vmatpush1.bf16.msra.mxu0 %v3358_v59  ;;  %2885 = vmatpush3.bf16.msra.mxu1 %v3407_v27 }
 0x484   :  { %2887 = vmatprep.subr.bf16.mxu0 %v3262_v8  ;;  %2918 = vmatprep.subr.bf16.mxu1 %v4004_v48 }
 0x539   :  { %v1227_v21 = vpop.f32.mrb[22].mxu0  ;;  %v1298_v0 = vpop.f32.mrb[18].mxu1 }
 0x53a   :  { %v1302_v33 = vadd.f32 %v1227_v21, %v3525_v46  ;;  %v1229_v51 = vpop.f32.mrb[23].mxu0  ;;  %v2444_v61 = vpop.f32.mrb[19].mxu1  ;;  %v1316_v9 = vadd.f32 %v3602_v17, %v1298_v0 }
 0x53b   :  { %v1309_v54 = vadd.f32 %v1229_v51, %v4012_v47 }
 0x53c   :  { %v2046_v41 = vmul.f32 -1.442695, %v1302_v33 }
 0x53d   :  { %v2047_v28 = vmul.f32 -1.442695, %v1309_v54 }
 0x53e   :  { %3080 = vpow2.f32 %v2046_v41 }
 0x53f   :  { %3082 = vpow2.f32 %v2047_v28  ;;  %v4014_v28 = vsel %vm3512_vm5, %v3537_v2, %v3482_v32 }
 0x548   :  { %v3081_v36 = vpop.eup %3080 }
 0x549   :  { %v1306_v34 = vadd.f32 1.0, %v3081_v36  ;;  %v3083_v62 = vpop.eup %3082 }
 0x54a   :  { %v1313_v3 = vadd.f32 1.0, %v3083_v62 }
 0x54b   :  { %3084 = vrcp.f32 %v1306_v34 }
 0x555   :  { %v3085_v53 = vpop.eup %3084 }
 0x556   :  { %v1317_v46 = vmul.f32 %v3085_v53, %v1316_v9 }
 0x558   :  { %v1318_v21 = vadd.f32 %v1317_v46, %v4013_v42 }
 0x55a   :  { %3086 = vtanh.f32 %v1318_v21  ;;  %v4015_v21 = vsel %vm3457_vm3, %v3455_v6, %v3449_v57  ;;  %v1876_v57 = vld [vmem:[#allocation6 + $0x80] sm:$0xff] }
 0x55b   :  { %3088 = vrcp.f32 %v1313_v3 }
 0x564   :  { %v3087_v30 = vpop.eup %3086 }
 0x565   :  { %v1320_v33 = vsub.f32 %v3767_v58, %v3087_v30  ;;  %v3089_v51 = vpop.eup %3088 }
 0x567   :  { %v1321_v61 = vmul.f32 %v3089_v51, %v1320_v33 }
 0x569   :  { %v3819_v47 = vadd.f32 %v3087_v30, %v1321_v61 }
 0x56b   :  { %1399 = vmatmul.mubr.f32.vlgmr.msra.gmra.mrb[24].mxu0 %v3819_v47  ;;  %2478 = vmatmul.mubr.f32.vlgmr.msra.gmra.mrb[20].mxu1 %v3819_v47 }
 0x56c   :  { %2889 = vmatpush1.bf16.msra.mxu0 %v3266_v11  ;;  %2920 = vmatpush3.bf16.msra.mxu1 %v3371_v63 }
 0x56d   :  { %2891 = vmatprep.subr.bf16.mxu0 %v3276_v16  ;;  %2921 = vmatprep.subr.bf16.mxu1 %v4004_v48 }
 0x56e   :  { %1571 = vmatprep.mubr.f32.mxu0 %v4005_v18  ;;  %2512 = vmatprep.mubr.msk.f32.mxu1 %vm3176_vm2, %v4005_v18 }
 0x570   :  { %2893 = vmatpush1.bf16.msra.mxu0 %v3280_v19  ;;  %2923 = vmatpush3.bf16.msra.mxu1 %v3379_v4 }
 0x571   :  { %2895 = vmatprep.subr.bf16.mxu0 %v3287_v23  ;;  %2924 = vmatprep.subr.bf16.mxu1 %v4004_v48 }
 0x574   :  { %2897 = vmatpush1.bf16.msra.mxu0 %v3298_v29  ;;  %2926 = vmatpush3.bf16.msra.mxu1 %v3387_v7 }
 0x575   :  { %2899 = vmatprep.subr.bf16.mxu0 %v3305_v31  ;;  %2927 = vmatprep.subr.bf16.mxu1 %v4004_v48 }
 0x578   :  { %2901 = vmatpush1.bf16.msra.mxu0 %v3316_v37  ;;  %2929 = vmatpush3.bf16.msra.mxu1 %v3391_v12 }
 0x579   :  { %2903 = vmatprep.subr.bf16.mxu0 %v3320_v38  ;;  %2930 = vmatprep.subr.bf16.mxu1 %v4004_v48 }
 0x57c   :  { %2905 = vmatpush1.bf16.msra.mxu0 %v3328_v43  ;;  %2932 = vmatpush3.bf16.msra.mxu1 %v3395_v15 }
 0x57d   :  { %2907 = vmatprep.subr.bf16.mxu0 %v3332_v44  ;;  %2933 = vmatprep.subr.bf16.mxu1 %v4004_v48 }
 0x580   :  { %2909 = vmatpush1.bf16.msra.mxu0 %v3338_v49  ;;  %2935 = vmatpush3.bf16.msra.mxu1 %v3399_v20 }
 0x581   :  { %2911 = vmatprep.subr.bf16.mxu0 %v3342_v50  ;;  %2936 = vmatprep.subr.bf16.mxu1 %v4004_v48 }
 0x584   :  { %2913 = vmatpush1.bf16.msra.mxu0 %v3348_v55  ;;  %2938 = vmatpush3.bf16.msra.mxu1 %v3403_v24 }
 0x585   :  { %2915 = vmatprep.subr.bf16.mxu0 %v3352_v56  ;;  %2939 = vmatprep.subr.bf16.mxu1 %v4004_v48 }
 0x588   :  { %2917 = vmatpush1.bf16.msra.mxu0 %v3358_v59  ;;  %2941 = vmatpush3.bf16.msra.mxu1 %v3407_v27 }
 0x589   :  { %2943 = vmatprep.subr.bf16.mxu0 %v3262_v8  ;;  %2974 = vmatprep.subr.bf16.mxu1 %v4004_v48 }
 0x63e   :  { %v1400_v52 = vpop.f32.mrb[24].mxu0  ;;  %v1471_v13 = vpop.f32.mrb[20].mxu1 }
 0x63f   :  { %v1475_v0 = vadd.f32 %v1400_v52, %v3545_v14  ;;  %v1402_v54 = vpop.f32.mrb[25].mxu0  ;;  %v2479_v41 = vpop.f32.mrb[21].mxu1  ;;  %v1489_v46 = vadd.f32 %v3602_v17, %v1471_v13  ;;  %v1862_v52 = vld [vmem:[#allocation6 + $0x10] sm:$0xff]  ;;  %v1863_v13 = vld [vmem:[#allocation6 + $0x18] sm:$0xff] }
 0x640   :  { %v1482_v36 = vadd.f32 %v1402_v54, %v4014_v28  ;;  %v1880_v54 = vld [vmem:[#allocation6 + $0xa0] sm:$0xff]  ;;  %v1881_v41 = vld [vmem:[#allocation6 + $0xa8] sm:$0xff] }
 0x641   :  { %v2048_v34 = vmul.f32 -1.442695, %v1475_v0  ;;  %v3004_v0 = vpack.c.bf16 %v1863_v13, %v1862_v52  ;;  %v3006_v28 = vpack.c.bf16 %v1881_v41, %v1880_v54  ;;  %v4021_v54 = vld [vmem:[#allocation11_spill] sm:$0xff] }
 0x642   :  { %v2049_v62 = vmul.f32 -1.442695, %v1482_v36  ;;  %v1864_v36 = vld [vmem:[#allocation6 + $0x20] sm:$0xff]  ;;  %v4023_v41 = vsel %vm3457_vm3, %v4021_v54, %v4022_v25 }
 0x643   :  { %3090 = vpow2.f32 %v2048_v34  ;;  %v1865_v34 = vld [vmem:[#allocation6 + $0x28] sm:$0xff] }
 0x644   :  { %3092 = vpow2.f32 %v2049_v62  ;;  %v3008_v62 = vpack.c.bf16 %v1865_v34, %v1864_v36 }
 0x64d   :  { %v3091_v9 = vpop.eup %3090 }
 0x64e   :  { %v1479_v53 = vadd.f32 1.0, %v3091_v9  ;;  %v3093_v8 = vpop.eup %3092  ;;  %v1882_v9 = vld [vmem:[#allocation6 + $0xb0] sm:$0xff] }
 0x64f   :  { %v1486_v32 = vadd.f32 1.0, %v3093_v8 }
 0x650   :  { %3094 = vrcp.f32 %v1479_v53  ;;  %v1883_v53 = vld [vmem:[#allocation6 + $0xb8] sm:$0xff] }
 0x651   :  { %v3010_v8 = vpack.c.bf16 %v1883_v53, %v1882_v9 }
 0x65a   :  { %v3095_v42 = vpop.eup %3094 }
 0x65b   :  { %v1490_v14 = vmul.f32 %v3095_v42, %v1489_v46  ;;  %v1866_v46 = vld [vmem:[#allocation6 + $0x30] sm:$0xff]  ;;  %v1867_v42 = vld [vmem:[#allocation6 + $0x38] sm:$0xff] }
 0x65d   :  { %v1491_v3 = vadd.f32 %v1490_v14, %v4015_v21  ;;  %v3012_v14 = vpack.c.bf16 %v1867_v42, %v1866_v46  ;;  %v1884_v21 = vld [vmem:[#allocation6 + $0xc0] sm:$0xff] }
 0x65f   :  { %3096 = vtanh.f32 %v1491_v3  ;;  %v1885_v3 = vld [vmem:[#allocation6 + $0xc8] sm:$0xff] }
 0x660   :  { %3098 = vrcp.f32 %v1486_v32  ;;  %v3014_v32 = vpack.c.bf16 %v1885_v3, %v1884_v21 }
 0x669   :  { %v3097_v2 = vpop.eup %3096 }
 0x66a   :  { %v1493_v30 = vsub.f32 %v3819_v47, %v3097_v2  ;;  %v3099_v33 = vpop.eup %3098 }
 0x66c   :  { %v1494_v51 = vmul.f32 %v3099_v33, %v1493_v30  ;;  %v1869_v30 = vld [vmem:[#allocation6 + $0x48] sm:$0xff]  ;;  %v1886_v33 = vld [vmem:[#allocation6 + $0xd0] sm:$0xff] }
 0x66e   :  { %v3871_v61 = vadd.f32 %v3097_v2, %v1494_v51  ;;  %v1868_v2 = vld [vmem:[#allocation6 + $0x40] sm:$0xff] }
 0x66f   :  { %v3016_v51 = vpack.c.bf16 %v1869_v30, %v1868_v2 }
 0x670   :  { %1572 = vmatmul.mubr.f32.vlgmr.msra.gmra.mrb[26].mxu0 %v3871_v61  ;;  %2513 = vmatmul.mubr.f32.vlgmr.msra.gmra.mrb[22].mxu1 %v3871_v61 }
 0x671   :  { %2945 = vmatpush1.bf16.msra.mxu0 %v3266_v11  ;;  %2976 = vmatpush3.bf16.msra.mxu1 %v3371_v63  ;;  %v4017_v63 = vsel %vm3457_vm3, %v3488_v45, %v3436_v39  ;;  %v1861_v39 = vld [vmem:[#allocation6 + $0x8] sm:$0xff] }
 0x672   :  { %2947 = vmatprep.subr.bf16.mxu0 %v3276_v16  ;;  %2977 = vmatprep.subr.bf16.mxu1 %v4004_v48 }
 0x673   :  { %1744 = vmatprep.mubr.f32.mxu0 %v4005_v18  ;;  %2547 = vmatprep.mubr.msk.f32.mxu1 %vm3176_vm2, %v4005_v18 }
 0x675   :  { %2949 = vmatpush1.bf16.msra.mxu0 %v3280_v19  ;;  %2979 = vmatpush3.bf16.msra.mxu1 %v3379_v4 }
 0x676   :  { %2951 = vmatprep.subr.bf16.mxu0 %v3287_v23  ;;  %2980 = vmatprep.subr.bf16.mxu1 %v4004_v48 }
 0x679   :  { %2953 = vmatpush1.bf16.msra.mxu0 %v3298_v29  ;;  %2982 = vmatpush3.bf16.msra.mxu1 %v3387_v7 }
 0x67a   :  { %2955 = vmatprep.subr.bf16.mxu0 %v3305_v31  ;;  %2983 = vmatprep.subr.bf16.mxu1 %v4004_v48  ;;  %v4016_v31 = vsel %vm3512_vm5, %v3557_v26, %v3453_v5  ;;  %v1877_v5 = vld [vmem:[#allocation6 + $0x88] sm:$0xff]  ;;  %v1860_v26 = vld [vmem:[#allocation6] sm:$0xff] }
 0x67b   :  { %v2998_v6 = vpack.c.bf16 %v1877_v5, %v1876_v57  ;;  %v3000_v45 = vpack.c.bf16 %v1861_v39, %v1860_v26  ;;  %v4019_v5 = vld [vmem:[#allocation12_spill] sm:$0xff] }
 0x67d   :  { %2957 = vmatpush1.bf16.msra.mxu0 %v3316_v37  ;;  %2985 = vmatpush3.bf16.msra.mxu1 %v3391_v12 }
 0x67e   :  { %2959 = vmatprep.subr.bf16.mxu0 %v3320_v38  ;;  %2986 = vmatprep.subr.bf16.mxu1 %v4004_v48 }
 0x681   :  { %2961 = vmatpush1.bf16.msra.mxu0 %v3328_v43  ;;  %2988 = vmatpush3.bf16.msra.mxu1 %v3395_v15 }
 0x682   :  { %2963 = vmatprep.subr.bf16.mxu0 %v3332_v44  ;;  %2989 = vmatprep.subr.bf16.mxu1 %v4004_v48 }
 0x685   :  { %2965 = vmatpush1.bf16.msra.mxu0 %v3338_v49  ;;  %2991 = vmatpush3.bf16.msra.mxu1 %v3399_v20 }
 0x686   :  { %2967 = vmatprep.subr.bf16.mxu0 %v3342_v50  ;;  %2992 = vmatprep.subr.bf16.mxu1 %v4004_v48 }
 0x689   :  { %2969 = vmatpush1.bf16.msra.mxu0 %v3348_v55  ;;  %2994 = vmatpush3.bf16.msra.mxu1 %v3403_v24 }
 0x68a   :  { %2971 = vmatprep.subr.bf16.mxu0 %v3352_v56  ;;  %2995 = vmatprep.subr.bf16.mxu1 %v4004_v48  ;;  %v1879_v48 = vld [vmem:[#allocation6 + $0x98] sm:$0xff] }
 0x68d   :  { %2973 = vmatpush1.bf16.msra.mxu0 %v3358_v59  ;;  %2997 = vmatpush3.bf16.msra.mxu1 %v3407_v27 }
 0x68e   :  { %2999 = vmatprep.subr.bf16.mxu0 %v2998_v6  ;;  %v4020_v6 = vsel %vm3512_vm5, %v3583_v40, %v4019_v5 }
 0x743   :  { %v1573_v11 = vpop.f32.mrb[26].mxu0  ;;  %v1644_v16 = vpop.f32.mrb[22].mxu1 }
 0x744   :  { %v1648_v19 = vadd.f32 %v1573_v11, %v3565_v22  ;;  %v1575_v23 = vpop.f32.mrb[27].mxu0  ;;  %v2514_v29 = vpop.f32.mrb[23].mxu1  ;;  %v1662_v55 = vadd.f32 %v3602_v17, %v1644_v16  ;;  %v1878_v22 = vld [vmem:[#allocation6 + $0x90] sm:$0xff]  ;;  %v1887_v11 = vld [vmem:[#allocation6 + $0xd8] sm:$0xff] }
 0x745   :  { %v1655_v37 = vadd.f32 %v1575_v23, %v4016_v31  ;;  %v3002_v18 = vpack.c.bf16 %v1879_v48, %v1878_v22  ;;  %v1870_v16 = vld [vmem:[#allocation6 + $0x50] sm:$0xff]  ;;  %v3018_v23 = vpack.c.bf16 %v1887_v11, %v1886_v33  ;;  %v1888_v29 = vld [vmem:[#allocation6 + $0xe0] sm:$0xff]  ;;  %v1889_v31 = vld [vmem:[#allocation6 + $0xe8] sm:$0xff] }
 0x746   :  { %v2050_v38 = vmul.f32 -1.442695, %v1648_v19  ;;  %v1871_v19 = vld [vmem:[#allocation6 + $0x58] sm:$0xff] }
 0x747   :  { %v2051_v43 = vmul.f32 -1.442695, %v1655_v37  ;;  %v3020_v37 = vpack.c.bf16 %v1871_v19, %v1870_v16 }
 0x748   :  { %3100 = vpow2.f32 %v2050_v38  ;;  %v3022_v38 = vpack.c.bf16 %v1889_v31, %v1888_v29 }
 0x749   :  { %3102 = vpow2.f32 %v2051_v43  ;;  %v1872_v43 = vld [vmem:[#allocation6 + $0x60] sm:$0xff] }
 0x752   :  { %v3101_v44 = vpop.eup %3100 }
 0x753   :  { %v1652_v49 = vadd.f32 1.0, %v3101_v44  ;;  %v3103_v50 = vpop.eup %3102  ;;  %v1873_v44 = vld [vmem:[#allocation6 + $0x68] sm:$0xff] }
 0x754   :  { %v1659_v7 = vadd.f32 1.0, %v3103_v50  ;;  %v1891_v50 = vld [vmem:[#allocation6 + $0xf8] sm:$0xff] }
 0x755   :  { %3104 = vrcp.f32 %v1652_v49  ;;  %v1890_v49 = vld [vmem:[#allocation6 + $0xf0] sm:$0xff] }
 0x75f   :  { %v3105_v56 = vpop.eup %3104 }
 0x760   :  { %v1663_v59 = vmul.f32 %v3105_v56, %v1662_v55  ;;  %v3024_v55 = vpack.c.bf16 %v1873_v44, %v1872_v43  ;;  %v3026_v56 = vpack.c.bf16 %v1891_v50, %v1890_v49 }
 0x762   :  { %v1664_v4 = vadd.f32 %v1663_v59, %v4017_v63  ;;  %v1874_v59 = vld [vmem:[#allocation6 + $0x70] sm:$0xff]  ;;  %v1875_v63 = vld [vmem:[#allocation6 + $0x78] sm:$0xff] }
 0x764   :  { %3106 = vtanh.f32 %v1664_v4  ;;  %v3028_v4 = vpack.c.bf16 %v1875_v63, %v1874_v59 }
 0x765   :  { %3108 = vrcp.f32 %v1659_v7 }
 0x76e   :  { %v3107_v12 = vpop.eup %3106 }
 0x76f   :  { %v1666_v15 = vsub.f32 %v3871_v61, %v3107_v12  ;;  %v3109_v20 = vpop.eup %3108 }
 0x771   :  { %v1667_v24 = vmul.f32 %v3109_v20, %v1666_v15  ;;  %v4018_v15 = vld [vmem:[#allocation13_spill] sm:$0xff] }
 0x773   :  { %v3921_v27 = vadd.f32 %v3107_v12, %v1667_v24 }
 0x775   :  { %1745 = vmatmul.mubr.f32.vlgmr.msra.gmra.mrb[28].mxu0 %v3921_v27  ;;  %2548 = vmatmul.mubr.f32.vlgmr.msra.gmra.mrb[24].mxu1 %v3921_v27 }
 0x776   :  { %3001 = vmatpush3.bf16.msra.mxu0 %v3000_v45 }
 0x777   :  { %3003 = vmatprep.subr.bf16.mxu0 %v3002_v18 }
 0x77a   :  { %3005 = vmatpush3.bf16.msra.mxu0 %v3004_v0 }
 0x77b   :  { %3007 = vmatprep.subr.bf16.mxu0 %v3006_v28 }
 0x77e   :  { %3009 = vmatpush3.bf16.msra.mxu0 %v3008_v62 }
 0x77f   :  { %3011 = vmatprep.subr.bf16.mxu0 %v3010_v8 }
 0x782   :  { %3013 = vmatpush3.bf16.msra.mxu0 %v3012_v14 }
 0x783   :  { %3015 = vmatprep.subr.bf16.mxu0 %v3014_v32 }
 0x786   :  { %3017 = vmatpush3.bf16.msra.mxu0 %v3016_v51 }
 0x787   :  { %3019 = vmatprep.subr.bf16.mxu0 %v3018_v23 }
 0x78a   :  { %3021 = vmatpush3.bf16.msra.mxu0 %v3020_v37 }
 0x78b   :  { %3023 = vmatprep.subr.bf16.mxu0 %v3022_v38 }
 0x78e   :  { %3025 = vmatpush3.bf16.msra.mxu0 %v3024_v55 }
 0x78f   :  { %3027 = vmatprep.subr.bf16.mxu0 %v3026_v56 }
 0x792   :  { %3029 = vmatpush3.bf16.msra.mxu0 %v3028_v4 }
 0x848   :  { %v1746_v7 = vpop.f32.mrb[28].mxu0  ;;  %v1817_v12 = vpop.f32.mrb[24].mxu1 }
 0x849   :  { %v1821_v20 = vadd.f32 %v1746_v7, %v4018_v15  ;;  %v1748_v24 = vpop.f32.mrb[29].mxu0  ;;  %v2549_v57 = vpop.f32.mrb[25].mxu1  ;;  %v1835_v52 = vadd.f32 %v3602_v17, %v1817_v12  ;;  %v2054_v17 = vld [vmem:[%s3986_s7] ss:$0 sm:$0xff] }
 0x84a   :  { %v1828_v26 = vadd.f32 %v1748_v24, %v4020_v6 }
 0x84b   :  { %v2052_v39 = vmul.f32 -1.442695, %v1821_v20 }
 0x84c   :  { %v2053_v45 = vmul.f32 -1.442695, %v1828_v26 }
 0x84d   :  { %3110 = vpow2.f32 %v2052_v39 }
 0x84e   :  { %3112 = vpow2.f32 %v2053_v45 }
 0x857   :  { %v3111_v22 = vpop.eup %3110 }
 0x858   :  { %v1825_v48 = vadd.f32 1.0, %v3111_v22  ;;  %v3113_v18 = vpop.eup %3112 }
 0x859   :  { %v1832_v40 = vadd.f32 1.0, %v3113_v18 }
 0x85a   :  { %3114 = vrcp.f32 %v1825_v48 }
 0x864   :  { %v3115_v13 = vpop.eup %3114 }
 0x865   :  { %v1836_v0 = vmul.f32 %v3115_v13, %v1835_v52 }
 0x867   :  { %v1837_v28 = vadd.f32 %v1836_v0, %v4023_v41 }
 0x869   :  { %3116 = vtanh.f32 %v1837_v28 }
 0x86a   :  { %3118 = vrcp.f32 %v1832_v40 }
 0x873   :  { %v3117_v36 = vpop.eup %3116 }
 0x874   :  { %v1839_v34 = vsub.f32 %v3921_v27, %v3117_v36  ;;  %v3119_v62 = vpop.eup %3118 }
 0x876   :  { %v1840_v9 = vmul.f32 %v3119_v62, %v1839_v34 }
 0x878   :  { %v1841_v53 = vadd.f32 %v3117_v36, %v1840_v9 }
 0x87a   :  { %1963 = vmatprep.mubr.f32.mxu0 %v1841_v53 }
 0x87b   :  { %1964 = vmatmul.mubr.f32.vlgmr.msra.gmra.mrb[30].mxu0 %v3611_v35 }
 0x87c   :  { %1968 = vmatprep.mubr.f32.mxu0 %v3921_v27 }
 0x87f   :  { %1969 = vmatmul.mubr.f32.gmra.mrb[32].mxu0 %v3663_v1 }
 0x880   :  { %1973 = vmatprep.mubr.f32.mxu0 %v3871_v61 }
 0x883   :  { %1974 = vmatmul.mubr.f32.gmra.mrb[34].mxu0 %v3715_v60 }
 0x884   :  { %1978 = vmatprep.mubr.f32.mxu0 %v3819_v47 }
 0x887   :  { %1979 = vmatmul.mubr.f32.gmra.mrb[36].mxu0 %v3767_v58 }
 0x888   :  { %1983 = vmatprep.mubr.f32.mxu0 %v3767_v58 }
 0x88b   :  { %1984 = vmatmul.mubr.f32.gmra.mrb[38].mxu0 %v3819_v47 }
 0x88c   :  { %1988 = vmatprep.mubr.f32.mxu0 %v3715_v60 }
 0x88f   :  { %1989 = vmatmul.mubr.f32.gmra.mrb[40].mxu0 %v3871_v61 }
 0x890   :  { %1993 = vmatprep.mubr.f32.mxu0 %v3663_v1 }
 0x893   :  { %1994 = vmatmul.mubr.f32.gmra.mrb[42].mxu0 %v3921_v27 }
 0x894   :  { %1998 = vmatprep.mubr.f32.mxu0 %v3611_v35 }
 0x897   :  { %1999 = vmatmul.mubr.f32.gmra.mrb[44].mxu0 %v1841_v53 }
 0x94e   :  { %v2232_v10 = vpop.f32.mrb[30].mxu0 }
 0x94f   :  { %v2233_v8 = vpop.f32.mrb[31].mxu0 }
 0x950   :  { %v2234_v58 = vadd.f32 %v2233_v8, %v2232_v10 }
 0x952   :  { %v1966_v46 = vadd.f32 %v2234_v58, %v2054_v17  ;;  %v2235_v47 = vpop.f32.mrb[32].mxu0 }
 0x953   :  { %v2236_v42 = vpop.f32.mrb[33].mxu0 }
 0x954   :  { %2004 = vst [vmem:[%s3987_s8] sm:$0xff] %v1966_v46  ;;  %v2237_v1 = vadd.f32 %v2236_v42, %v2235_v47 }
 0x956   :  { %v1971_v60 = vadd.f32 %v2237_v1, %v2054_v17  ;;  %v2238_v61 = vpop.f32.mrb[34].mxu0 }
 0x957   :  { %v2239_v27 = vpop.f32.mrb[35].mxu0 }
 0x958   :  { %2005 = vst [vmem:[%s3987_s8 + $0x8] sm:$0xff] %v1971_v60  ;;  %v2240_v35 = vadd.f32 %v2239_v27, %v2238_v61 }
 0x95a   :  { %v1976_v14 = vadd.f32 %v2240_v35, %v2054_v17  ;;  %v2241_v21 = vpop.f32.mrb[36].mxu0 }
 0x95b   :  { %v2242_v3 = vpop.f32.mrb[37].mxu0 }
 0x95c   :  { %2006 = vst [vmem:[%s3987_s8 + $0x10] sm:$0xff] %v1976_v14  ;;  %v2243_v32 = vadd.f32 %v2242_v3, %v2241_v21 }
 0x95e   :  { %v1981_v2 = vadd.f32 %v2243_v32, %v2054_v17  ;;  %v2244_v30 = vpop.f32.mrb[38].mxu0 }
 0x95f   :  { %v2245_v33 = vpop.f32.mrb[39].mxu0 }
 0x960   :  { %2007 = vst [vmem:[%s3987_s8 + $0x18] sm:$0xff] %v1981_v2  ;;  %v2246_v51 = vadd.f32 %v2245_v33, %v2244_v30 }
 0x962   :  { %v1986_v11 = vadd.f32 %v2246_v51, %v2054_v17  ;;  %v2247_v16 = vpop.f32.mrb[40].mxu0 }
 0x963   :  { %v2248_v19 = vpop.f32.mrb[41].mxu0 }
 0x964   :  { %2008 = vst [vmem:[%s3987_s8 + $0x20] sm:$0xff] %v1986_v11  ;;  %v2249_v23 = vadd.f32 %v2248_v19, %v2247_v16 }
 0x966   :  { %v1991_v29 = vadd.f32 %v2249_v23, %v2054_v17  ;;  %v2250_v31 = vpop.f32.mrb[42].mxu0 }
 0x967   :  { %v2251_v37 = vpop.f32.mrb[43].mxu0 }
 0x968   :  { %2009 = vst [vmem:[%s3987_s8 + $0x28] sm:$0xff] %v1991_v29  ;;  %v2252_v38 = vadd.f32 %v2251_v37, %v2250_v31 }
 0x96a   :  { %v1996_v43 = vadd.f32 %v2252_v38, %v2054_v17  ;;  %v2253_v44 = vpop.f32.mrb[44].mxu0 }
 0x96b   :  { %v2254_v49 = vpop.f32.mrb[45].mxu0 }
 0x96c   :  { %2010 = vst [vmem:[%s3987_s8 + $0x30] sm:$0xff] %v1996_v43  ;;  %v2255_v50 = vadd.f32 %v2254_v49, %v2253_v44 }
 0x96e   :  { %v2001_v55 = vadd.f32 %v2255_v50, %v2054_v17 }
 0x970   :  { %2011 = vst [vmem:[%s3987_s8 + $0x38] sm:$0xff] %v2001_v55 }
 0x971   :  { %2016 = vsyncpa [#allocation5], 1 }
 0x972   :  { %2017 = vsyncpa [#allocation7], 1 }

</bundles_post_ra>
